<compile_context>
chip_gen: v5e
topology: v5e:2x2
jax: 0.10.0
libtpu: 0.0.40
codegen_flags: <defaults>
</compile_context>

<pallas_src>
import functools

import jax
import jax.numpy as jnp
from jax import lax
from jax.experimental import pallas as pl
from jax.experimental.pallas import tpu as pltpu


_HAS_BUFFERED = hasattr(pl, "Buffered")


def _const_spec(block_shape, single_buffer):
    """BlockSpec for grid-invariant operands (stacked weights / biases)."""
    index_map = lambda b, qi: (0,) * len(block_shape)
    if single_buffer and _HAS_BUFFERED:
        try:
            return pl.BlockSpec(block_shape, index_map,
                                pipeline_mode=pl.Buffered(1))
        except TypeError:  # older jax without pipeline_mode kwarg
            pass
    return pl.BlockSpec(block_shape, index_map)


def _clip_attn_kernel(x_ref, w_ref, b_ref, out_ref, ctx_ref, *,
                      num_heads, head_dim, q_block):
    f32 = jnp.float32
    bf16 = jnp.bfloat16
    T = x_ref.shape[1]

    x = x_ref[0]                              # (T, E) bf16, full sequence (K/V source)
    if q_block == T:
        xq = x                                # single q tile: reuse, no second load
    else:
        start = pl.multiple_of(pl.program_id(1) * q_block, q_block)
        xq = x_ref[0, pl.ds(start, q_block), :]   # (TQ, E) query rows for this tile

    # Projections: bf16 MXU operands, f32 accumulation, f32 bias add.
    # The 1/sqrt(head_dim) scale is folded into w_ref[0] / b_ref[0].
    q = jnp.dot(xq, w_ref[0], preferred_element_type=f32) + b_ref[0]   # (TQ, E)
    k = jnp.dot(x,  w_ref[1], preferred_element_type=f32) + b_ref[1]   # (T,  E)
    v = jnp.dot(x,  w_ref[2], preferred_element_type=f32) + b_ref[2]   # (T,  E)

    qk_dnums = (((1,), (1,)), ((), ()))       # contract head_dim of q & k (no kh.T)
    pv_dnums = (((1,), (0,)), ((), ()))

    for h in range(num_heads):                # static unroll over heads
        lo = h * head_dim
        hi = lo + head_dim
        qh = q[:, lo:hi].astype(bf16)         # (TQ, hd)
        kh = k[:, lo:hi].astype(bf16)         # (T,  hd)
        vh = v[:, lo:hi].astype(bf16)         # (T,  hd)

        s = lax.dot_general(qh, kh, qk_dnums, preferred_element_type=f32)  # (TQ, T)
        s = s - jnp.max(s, axis=-1, keepdims=True)       # stable softmax
        p = jnp.exp(s)                                   # unnormalized probs (<= 1)
        denom = jnp.sum(p, axis=-1, keepdims=True)       # (TQ, 1) f32

        ctx_h = lax.dot_general(p.astype(bf16), vh, pv_dnums,
                                preferred_element_type=f32)              # (TQ, hd)
        # Normalize after PV (linear in p): touches (TQ, hd), not (TQ, T).
        ctx_h = ctx_h * pl.reciprocal(denom, approx=True)
        ctx_ref[:, lo:hi] = ctx_h.astype(bf16)

    out = jnp.dot(ctx_ref[...], w_ref[3], preferred_element_type=f32) + b_ref[3]
    out_ref[0] = out.astype(out_ref.dtype)


def prepare_params(params, *, num_heads):
    """One-time parameter preparation (outside the kernel / hot path):
    fold the 1/sqrt(head_dim) scale into q_proj, stack the four ExE weights
    into one bf16 (4, E, E) operand and the biases into one f32 (4, 1, E)."""
    E = params["wq"].shape[0]
    head_dim = E // num_heads
    scale = float(head_dim) ** -0.5
    f32, bf16 = jnp.float32, jnp.bfloat16
    w = jnp.stack([
        params["wq"].astype(f32) * scale,
        params["wk"].astype(f32),
        params["wv"].astype(f32),
        params["wo"].astype(f32),
    ]).astype(bf16)                                   # (4, E, E) bf16
    b = jnp.stack([
        params["bq"].astype(f32) * scale,
        params["bk"].astype(f32),
        params["bv"].astype(f32),
        params["bo"].astype(f32),
    ])                                                # (4, 1, E) f32
    return {"w": w, "b": b}


def _vmem_cap_bytes():
    """Per-generation safe scoped-VMEM cap (physical minus headroom)."""
    try:
        phys = int(pltpu.get_tpu_info().vmem_capacity_bytes)
    except Exception:
        phys = 64 << 20        # conservative: v7x has 64 MiB per TensorCore
    return max(phys - (8 << 20), 16 << 20)


def clip_attention(hidden_states, prepared, *, num_heads, q_block=None):
    """hidden_states: (B, T, E).  prepared: output of prepare_params()."""
    B, T, E = hidden_states.shape
    head_dim = E // num_heads
    assert head_dim * num_heads == E
    if q_block is None:
        q_block = T                       # single query tile by default
    assert T % q_block == 0
    assert q_block == T or q_block % 8 == 0, "q-tiling needs 8-aligned tiles"
    num_q_blocks = T // q_block

    out_dtype = hidden_states.dtype
    x_bf16 = hidden_states.astype(jnp.bfloat16)       # stream activations as bf16

    kernel = functools.partial(_clip_attn_kernel, num_heads=num_heads,
                               head_dim=head_dim, q_block=q_block)

    # VMEM estimate (bytes) after the bf16-input / single-x-stream changes.
    est = (4 * E * E * 2                      # stacked bf16 weights (1 buf)
           + 4 * E * 4                        # stacked f32 biases
           + 2 * T * E * 2                    # x block, bf16, 2 bufs
           + 2 * q_block * E * 4              # out block, f32, 2 bufs
           + 3 * T * E * 4                    # q / k / v f32 slabs
           + q_block * E * 2                  # ctx scratch, bf16
           + 2 * q_block * T * 4)             # score + prob slabs

    compiler_kwargs = dict(dimension_semantics=("parallel", "parallel"))
    if est > (16 << 20):   # above the smallest (v5e) default scoped VMEM
        compiler_kwargs["vmem_limit_bytes"] = min(int(est * 5 // 4),
                                                  _vmem_cap_bytes())

    def _run(single_buffer_weights):
        return pl.pallas_call(
            kernel,
            out_shape=jax.ShapeDtypeStruct((B, T, E), out_dtype),
            grid_spec=pltpu.PrefetchScalarGridSpec(
                num_scalar_prefetch=0,
                grid=(B, num_q_blocks),
                in_specs=[
                    pl.BlockSpec((1, T, E), lambda b, qi: (b, 0, 0)),  # x (full seq)
                    _const_spec((4, E, E), single_buffer_weights),     # stacked weights
                    _const_spec((4, 1, E), single_buffer_weights),     # stacked biases
                ],
                out_specs=pl.BlockSpec((1, q_block, E), lambda b, qi: (b, qi, 0)),
                scratch_shapes=[pltpu.VMEM((q_block, E), jnp.bfloat16)],
            ),
            compiler_params=pltpu.CompilerParams(**compiler_kwargs),
        )(x_bf16, prepared["w"], prepared["b"])

    if _HAS_BUFFERED:
        try:
            return _run(single_buffer_weights=True)
        except Exception:
            # Only the Buffered(1)-weights attempt is guarded; the default
            # double-buffered fallback below propagates any real error.
            pass
    return _run(single_buffer_weights=False)


def clip_attention_ref(hidden_states, params, *, num_heads):
    """Pure-JAX f32 reference mirroring the PyTorch forward (masks=None, p=0)."""
    B, T, E = hidden_states.shape
    hd = E // num_heads
    scale = float(hd) ** -0.5

    def proj(x, w, b):
        return x @ w + b[0]

    q = proj(hidden_states, params["wq"], params["bq"]) * scale
    k = proj(hidden_states, params["wk"], params["bk"])
    v = proj(hidden_states, params["wv"], params["bv"])

    def to_heads(t):
        return t.reshape(B, T, num_heads, hd).transpose(0, 2, 1, 3)

    qh, kh, vh = to_heads(q), to_heads(k), to_heads(v)
    attn = jnp.einsum("bhqd,bhkd->bhqk", qh, kh)
    attn = jax.nn.softmax(attn, axis=-1)
    ctx = jnp.einsum("bhqk,bhkd->bhqd", attn, vh)
    ctx = ctx.transpose(0, 2, 1, 3).reshape(B, T, E)
    return proj(ctx, params["wo"], params["bo"])


if __name__ == "__main__":
    # Small synthetic config: batch=2, seq=8, hidden=32, heads=4 (head_dim=8).
    B, T, E, H = 2, 8, 32, 4
    # TODO(synk): attention_mask / causal_attention_mask inputs are None in
    # this forward and dropout p=0 (eval mode), so both are identity here;
    # the output_attentions return value is not produced.

    key = jax.random.PRNGKey(0)
    ks = jax.random.split(key, 9)
    init = lambda k, shape, s=0.05: (s * jax.random.normal(k, shape)).astype(jnp.float32)

    params = {
        "wq": init(ks[0], (E, E)), "bq": init(ks[1], (1, E)),
        "wk": init(ks[2], (E, E)), "bk": init(ks[3], (1, E)),
        "wv": init(ks[4], (E, E)), "bv": init(ks[5], (1, E)),
        "wo": init(ks[6], (E, E)), "bo": init(ks[7], (1, E)),
    }
    x = jax.random.normal(ks[8], (B, T, E), dtype=jnp.float32)

    prepared = prepare_params(params, num_heads=H)   # one-time prep (scale fold + bf16 + stack)
    out = clip_attention(x, prepared, num_heads=H)
    out = jax.block_until_ready(out)

    ref = clip_attention_ref(x, params, num_heads=H)
    assert out.shape == (B, T, E)
    max_err = float(jnp.max(jnp.abs(out - ref)))
    # bf16 matmul operands (f32 accumulation) + approx reciprocal => small deviation vs f32 ref.
    assert max_err < 2e-2, f"mismatch vs reference: max abs err {max_err}"

    print("KERNEL_OK")
</pallas_src>

<mosaic_0001>
module attributes {stable_mosaic.version = 11 : i64} {
  func.func @_clip_attn_kernel(%arg0: i32, %arg1: i32, %arg2: memref<1x8x32xbf16, #tpu.memory_space<vmem>>, %arg3: memref<4x32x32xbf16, #tpu.memory_space<vmem>>, %arg4: memref<4x1x32xf32, #tpu.memory_space<vmem>>, %arg5: memref<1x8x32xf32, #tpu.memory_space<vmem>>, %arg6: memref<8x32xbf16, #tpu.memory_space<vmem>>) attributes {dimension_semantics = [#tpu.dimension_semantics<parallel>, #tpu.dimension_semantics<parallel>], iteration_bounds = array<i64: 2, 1>, scalar_prefetch = 0 : i64, scratch_operands = 1 : i64, tpu.core_type = #tpu.core_type<tc>, window_params = [{transform_indices = @transform_0, window_bounds = array<i64: 1, 8, 32>}, {pipeline_mode = #tpu.pipeline_mode<synchronous>, transform_indices = @transform_1, window_bounds = array<i64: 4, 32, 32>}, {pipeline_mode = #tpu.pipeline_mode<synchronous>, transform_indices = @transform_2, window_bounds = array<i64: 4, 1, 32>}, {transform_indices = @transform_3, window_bounds = array<i64: 1, 8, 32>}]} {
    %c0 = arith.constant 0 : index
    %c0_0 = arith.constant 0 : index
    %c0_1 = arith.constant 0 : index
    %0 = vector.load %arg2[%c0, %c0_0, %c0_1] : memref<1x8x32xbf16, #tpu.memory_space<vmem>>, vector<1x8x32xbf16>
    %1 = vector.shape_cast %0 : vector<1x8x32xbf16> to vector<8x32xbf16>
    %c0_2 = arith.constant 0 : index
    %c0_3 = arith.constant 0 : index
    %c0_4 = arith.constant 0 : index
    %2 = vector.load %arg3[%c0_2, %c0_3, %c0_4] : memref<4x32x32xbf16, #tpu.memory_space<vmem>>, vector<1x32x32xbf16>
    %3 = vector.shape_cast %2 : vector<1x32x32xbf16> to vector<32x32xbf16>
    %cst = arith.constant dense<0.000000e+00> : vector<8x32xf32>
    %4 = tpu.matmul %1, %3, %cst {dimension_numbers = #tpu.dot_dimension_numbers<[1], [0], [0], [1], [0, 0, 1, 1], [], []>} : vector<8x32xbf16>, vector<32x32xbf16>, vector<8x32xf32> -> vector<8x32xf32>
    %c0_5 = arith.constant 0 : index
    %c0_6 = arith.constant 0 : index
    %c0_7 = arith.constant 0 : index
    %5 = vector.load %arg4[%c0_5, %c0_6, %c0_7] : memref<4x1x32xf32, #tpu.memory_space<vmem>>, vector<1x1x32xf32>
    %6 = vector.shape_cast %5 : vector<1x1x32xf32> to vector<1x32xf32>
    %7 = vector.broadcast %6 : vector<1x32xf32> to vector<8x32xf32>
    %8 = arith.addf %4, %7 : vector<8x32xf32>
    %c1 = arith.constant 1 : index
    %c0_8 = arith.constant 0 : index
    %c0_9 = arith.constant 0 : index
    %9 = vector.load %arg3[%c1, %c0_8, %c0_9] : memref<4x32x32xbf16, #tpu.memory_space<vmem>>, vector<1x32x32xbf16>
    %10 = vector.shape_cast %9 : vector<1x32x32xbf16> to vector<32x32xbf16>
    %cst_10 = arith.constant dense<0.000000e+00> : vector<8x32xf32>
    %11 = tpu.matmul %1, %10, %cst_10 {dimension_numbers = #tpu.dot_dimension_numbers<[1], [0], [0], [1], [0, 0, 1, 1], [], []>} : vector<8x32xbf16>, vector<32x32xbf16>, vector<8x32xf32> -> vector<8x32xf32>
    %c1_11 = arith.constant 1 : index
    %c0_12 = arith.constant 0 : index
    %c0_13 = arith.constant 0 : index
    %12 = vector.load %arg4[%c1_11, %c0_12, %c0_13] : memref<4x1x32xf32, #tpu.memory_space<vmem>>, vector<1x1x32xf32>
    %13 = vector.shape_cast %12 : vector<1x1x32xf32> to vector<1x32xf32>
    %14 = vector.broadcast %13 : vector<1x32xf32> to vector<8x32xf32>
    %15 = arith.addf %11, %14 : vector<8x32xf32>
    %c2 = arith.constant 2 : index
    %c0_14 = arith.constant 0 : index
    %c0_15 = arith.constant 0 : index
    %16 = vector.load %arg3[%c2, %c0_14, %c0_15] : memref<4x32x32xbf16, #tpu.memory_space<vmem>>, vector<1x32x32xbf16>
    %17 = vector.shape_cast %16 : vector<1x32x32xbf16> to vector<32x32xbf16>
    %cst_16 = arith.constant dense<0.000000e+00> : vector<8x32xf32>
    %18 = tpu.matmul %1, %17, %cst_16 {dimension_numbers = #tpu.dot_dimension_numbers<[1], [0], [0], [1], [0, 0, 1, 1], [], []>} : vector<8x32xbf16>, vector<32x32xbf16>, vector<8x32xf32> -> vector<8x32xf32>
    %c2_17 = arith.constant 2 : index
    %c0_18 = arith.constant 0 : index
    %c0_19 = arith.constant 0 : index
    %19 = vector.load %arg4[%c2_17, %c0_18, %c0_19] : memref<4x1x32xf32, #tpu.memory_space<vmem>>, vector<1x1x32xf32>
    %20 = vector.shape_cast %19 : vector<1x1x32xf32> to vector<1x32xf32>
    %21 = vector.broadcast %20 : vector<1x32xf32> to vector<8x32xf32>
    %22 = arith.addf %18, %21 : vector<8x32xf32>
    %23 = vector.extract_strided_slice %8 {offsets = [0, 0], sizes = [8, 8], strides = [1, 1]} : vector<8x32xf32> to vector<8x8xf32>
    %24 = arith.truncf %23 : vector<8x8xf32> to vector<8x8xbf16>
    %25 = vector.extract_strided_slice %15 {offsets = [0, 0], sizes = [8, 8], strides = [1, 1]} : vector<8x32xf32> to vector<8x8xf32>
    %26 = arith.truncf %25 : vector<8x8xf32> to vector<8x8xbf16>
    %27 = vector.extract_strided_slice %22 {offsets = [0, 0], sizes = [8, 8], strides = [1, 1]} : vector<8x32xf32> to vector<8x8xf32>
    %28 = arith.truncf %27 : vector<8x8xf32> to vector<8x8xbf16>
    %cst_20 = arith.constant dense<0.000000e+00> : vector<8x8xf32>
    %29 = tpu.matmul %24, %26, %cst_20 {dimension_numbers = #tpu.dot_dimension_numbers<[1], [1], [0], [0], [0, 0, 1, 0], [], []>} : vector<8x8xbf16>, vector<8x8xbf16>, vector<8x8xf32> -> vector<8x8xf32>
    %cst_21 = arith.constant dense<0xFF800000> : vector<8xf32>
    %30 = vector.multi_reduction <maximumf>, %29, %cst_21 [1] : vector<8x8xf32> to vector<8xf32>
    %31 = vector.shape_cast %30 : vector<8xf32> to vector<8x1xf32>
    %32 = vector.broadcast %31 : vector<8x1xf32> to vector<8x8xf32>
    %33 = arith.subf %29, %32 : vector<8x8xf32>
    %34 = math.exp %33 : vector<8x8xf32>
    %cst_22 = arith.constant dense<0.000000e+00> : vector<8xf32>
    %35 = vector.multi_reduction <add>, %34, %cst_22 [1] : vector<8x8xf32> to vector<8xf32>
    %36 = vector.shape_cast %35 : vector<8xf32> to vector<8x1xf32>
    %37 = arith.truncf %34 : vector<8x8xf32> to vector<8x8xbf16>
    %cst_23 = arith.constant dense<0.000000e+00> : vector<8x8xf32>
    %38 = tpu.matmul %37, %28, %cst_23 {dimension_numbers = #tpu.dot_dimension_numbers<[1], [0], [0], [1], [0, 0, 1, 1], [], []>} : vector<8x8xbf16>, vector<8x8xbf16>, vector<8x8xf32> -> vector<8x8xf32>
    %39 = tpu.reciprocal %36 {approx = true} : vector<8x1xf32> -> vector<8x1xf32>
    %40 = vector.broadcast %39 : vector<8x1xf32> to vector<8x8xf32>
    %41 = arith.mulf %38, %40 : vector<8x8xf32>
    %42 = arith.truncf %41 : vector<8x8xf32> to vector<8x8xbf16>
    %c0_24 = arith.constant 0 : index
    %c0_25 = arith.constant 0 : index
    %43 = vector.load %arg6[%c0_24, %c0_25] : memref<8x32xbf16, #tpu.memory_space<vmem>>, vector<8x8xbf16>
    tpu.vector_store %arg6[%c0_24, %c0_25], %42 {strides = array<i32>} : memref<8x32xbf16, #tpu.memory_space<vmem>>, vector<8x8xbf16>,
    %44 = vector.extract_strided_slice %8 {offsets = [0, 8], sizes = [8, 8], strides = [1, 1]} : vector<8x32xf32> to vector<8x8xf32>
    %45 = arith.truncf %44 : vector<8x8xf32> to vector<8x8xbf16>
    %46 = vector.extract_strided_slice %15 {offsets = [0, 8], sizes = [8, 8], strides = [1, 1]} : vector<8x32xf32> to vector<8x8xf32>
    %47 = arith.truncf %46 : vector<8x8xf32> to vector<8x8xbf16>
    %48 = vector.extract_strided_slice %22 {offsets = [0, 8], sizes = [8, 8], strides = [1, 1]} : vector<8x32xf32> to vector<8x8xf32>
    %49 = arith.truncf %48 : vector<8x8xf32> to vector<8x8xbf16>
    %cst_26 = arith.constant dense<0.000000e+00> : vector<8x8xf32>
    %50 = tpu.matmul %45, %47, %cst_26 {dimension_numbers = #tpu.dot_dimension_numbers<[1], [1], [0], [0], [0, 0, 1, 0], [], []>} : vector<8x8xbf16>, vector<8x8xbf16>, vector<8x8xf32> -> vector<8x8xf32>
    %cst_27 = arith.constant dense<0xFF800000> : vector<8xf32>
    %51 = vector.multi_reduction <maximumf>, %50, %cst_27 [1] : vector<8x8xf32> to vector<8xf32>
    %52 = vector.shape_cast %51 : vector<8xf32> to vector<8x1xf32>
    %53 = vector.broadcast %52 : vector<8x1xf32> to vector<8x8xf32>
    %54 = arith.subf %50, %53 : vector<8x8xf32>
    %55 = math.exp %54 : vector<8x8xf32>
    %cst_28 = arith.constant dense<0.000000e+00> : vector<8xf32>
    %56 = vector.multi_reduction <add>, %55, %cst_28 [1] : vector<8x8xf32> to vector<8xf32>
    %57 = vector.shape_cast %56 : vector<8xf32> to vector<8x1xf32>
    %58 = arith.truncf %55 : vector<8x8xf32> to vector<8x8xbf16>
    %cst_29 = arith.constant dense<0.000000e+00> : vector<8x8xf32>
    %59 = tpu.matmul %58, %49, %cst_29 {dimension_numbers = #tpu.dot_dimension_numbers<[1], [0], [0], [1], [0, 0, 1, 1], [], []>} : vector<8x8xbf16>, vector<8x8xbf16>, vector<8x8xf32> -> vector<8x8xf32>
    %60 = tpu.reciprocal %57 {approx = true} : vector<8x1xf32> -> vector<8x1xf32>
    %61 = vector.broadcast %60 : vector<8x1xf32> to vector<8x8xf32>
    %62 = arith.mulf %59, %61 : vector<8x8xf32>
    %63 = arith.truncf %62 : vector<8x8xf32> to vector<8x8xbf16>
    %c0_30 = arith.constant 0 : index
    %c8 = arith.constant 8 : index
    %64 = vector.load %arg6[%c0_30, %c8] : memref<8x32xbf16, #tpu.memory_space<vmem>>, vector<8x8xbf16>
    tpu.vector_store %arg6[%c0_30, %c8], %63 {strides = array<i32>} : memref<8x32xbf16, #tpu.memory_space<vmem>>, vector<8x8xbf16>,
    %65 = vector.extract_strided_slice %8 {offsets = [0, 16], sizes = [8, 8], strides = [1, 1]} : vector<8x32xf32> to vector<8x8xf32>
    %66 = arith.truncf %65 : vector<8x8xf32> to vector<8x8xbf16>
    %67 = vector.extract_strided_slice %15 {offsets = [0, 16], sizes = [8, 8], strides = [1, 1]} : vector<8x32xf32> to vector<8x8xf32>
    %68 = arith.truncf %67 : vector<8x8xf32> to vector<8x8xbf16>
    %69 = vector.extract_strided_slice %22 {offsets = [0, 16], sizes = [8, 8], strides = [1, 1]} : vector<8x32xf32> to vector<8x8xf32>
    %70 = arith.truncf %69 : vector<8x8xf32> to vector<8x8xbf16>
    %cst_31 = arith.constant dense<0.000000e+00> : vector<8x8xf32>
    %71 = tpu.matmul %66, %68, %cst_31 {dimension_numbers = #tpu.dot_dimension_numbers<[1], [1], [0], [0], [0, 0, 1, 0], [], []>} : vector<8x8xbf16>, vector<8x8xbf16>, vector<8x8xf32> -> vector<8x8xf32>
    %cst_32 = arith.constant dense<0xFF800000> : vector<8xf32>
    %72 = vector.multi_reduction <maximumf>, %71, %cst_32 [1] : vector<8x8xf32> to vector<8xf32>
    %73 = vector.shape_cast %72 : vector<8xf32> to vector<8x1xf32>
    %74 = vector.broadcast %73 : vector<8x1xf32> to vector<8x8xf32>
    %75 = arith.subf %71, %74 : vector<8x8xf32>
    %76 = math.exp %75 : vector<8x8xf32>
    %cst_33 = arith.constant dense<0.000000e+00> : vector<8xf32>
    %77 = vector.multi_reduction <add>, %76, %cst_33 [1] : vector<8x8xf32> to vector<8xf32>
    %78 = vector.shape_cast %77 : vector<8xf32> to vector<8x1xf32>
    %79 = arith.truncf %76 : vector<8x8xf32> to vector<8x8xbf16>
    %cst_34 = arith.constant dense<0.000000e+00> : vector<8x8xf32>
    %80 = tpu.matmul %79, %70, %cst_34 {dimension_numbers = #tpu.dot_dimension_numbers<[1], [0], [0], [1], [0, 0, 1, 1], [], []>} : vector<8x8xbf16>, vector<8x8xbf16>, vector<8x8xf32> -> vector<8x8xf32>
    %81 = tpu.reciprocal %78 {approx = true} : vector<8x1xf32> -> vector<8x1xf32>
    %82 = vector.broadcast %81 : vector<8x1xf32> to vector<8x8xf32>
    %83 = arith.mulf %80, %82 : vector<8x8xf32>
    %84 = arith.truncf %83 : vector<8x8xf32> to vector<8x8xbf16>
    %c0_35 = arith.constant 0 : index
    %c16 = arith.constant 16 : index
    %85 = vector.load %arg6[%c0_35, %c16] : memref<8x32xbf16, #tpu.memory_space<vmem>>, vector<8x8xbf16>
    tpu.vector_store %arg6[%c0_35, %c16], %84 {strides = array<i32>} : memref<8x32xbf16, #tpu.memory_space<vmem>>, vector<8x8xbf16>,
    %86 = vector.extract_strided_slice %8 {offsets = [0, 24], sizes = [8, 8], strides = [1, 1]} : vector<8x32xf32> to vector<8x8xf32>
    %87 = arith.truncf %86 : vector<8x8xf32> to vector<8x8xbf16>
    %88 = vector.extract_strided_slice %15 {offsets = [0, 24], sizes = [8, 8], strides = [1, 1]} : vector<8x32xf32> to vector<8x8xf32>
    %89 = arith.truncf %88 : vector<8x8xf32> to vector<8x8xbf16>
    %90 = vector.extract_strided_slice %22 {offsets = [0, 24], sizes = [8, 8], strides = [1, 1]} : vector<8x32xf32> to vector<8x8xf32>
    %91 = arith.truncf %90 : vector<8x8xf32> to vector<8x8xbf16>
    %cst_36 = arith.constant dense<0.000000e+00> : vector<8x8xf32>
    %92 = tpu.matmul %87, %89, %cst_36 {dimension_numbers = #tpu.dot_dimension_numbers<[1], [1], [0], [0], [0, 0, 1, 0], [], []>} : vector<8x8xbf16>, vector<8x8xbf16>, vector<8x8xf32> -> vector<8x8xf32>
    %cst_37 = arith.constant dense<0xFF800000> : vector<8xf32>
    %93 = vector.multi_reduction <maximumf>, %92, %cst_37 [1] : vector<8x8xf32> to vector<8xf32>
    %94 = vector.shape_cast %93 : vector<8xf32> to vector<8x1xf32>
    %95 = vector.broadcast %94 : vector<8x1xf32> to vector<8x8xf32>
    %96 = arith.subf %92, %95 : vector<8x8xf32>
    %97 = math.exp %96 : vector<8x8xf32>
    %cst_38 = arith.constant dense<0.000000e+00> : vector<8xf32>
    %98 = vector.multi_reduction <add>, %97, %cst_38 [1] : vector<8x8xf32> to vector<8xf32>
    %99 = vector.shape_cast %98 : vector<8xf32> to vector<8x1xf32>
    %100 = arith.truncf %97 : vector<8x8xf32> to vector<8x8xbf16>
    %cst_39 = arith.constant dense<0.000000e+00> : vector<8x8xf32>
    %101 = tpu.matmul %100, %91, %cst_39 {dimension_numbers = #tpu.dot_dimension_numbers<[1], [0], [0], [1], [0, 0, 1, 1], [], []>} : vector<8x8xbf16>, vector<8x8xbf16>, vector<8x8xf32> -> vector<8x8xf32>
    %102 = tpu.reciprocal %99 {approx = true} : vector<8x1xf32> -> vector<8x1xf32>
    %103 = vector.broadcast %102 : vector<8x1xf32> to vector<8x8xf32>
    %104 = arith.mulf %101, %103 : vector<8x8xf32>
    %105 = arith.truncf %104 : vector<8x8xf32> to vector<8x8xbf16>
    %c0_40 = arith.constant 0 : index
    %c24 = arith.constant 24 : index
    %106 = vector.load %arg6[%c0_40, %c24] : memref<8x32xbf16, #tpu.memory_space<vmem>>, vector<8x8xbf16>
    tpu.vector_store %arg6[%c0_40, %c24], %105 {strides = array<i32>} : memref<8x32xbf16, #tpu.memory_space<vmem>>, vector<8x8xbf16>,
    %c0_41 = arith.constant 0 : index
    %c0_42 = arith.constant 0 : index
    %107 = vector.load %arg6[%c0_41, %c0_42] : memref<8x32xbf16, #tpu.memory_space<vmem>>, vector<8x32xbf16>
    %c3 = arith.constant 3 : index
    %c0_43 = arith.constant 0 : index
    %c0_44 = arith.constant 0 : index
    %108 = vector.load %arg3[%c3, %c0_43, %c0_44] : memref<4x32x32xbf16, #tpu.memory_space<vmem>>, vector<1x32x32xbf16>
    %109 = vector.shape_cast %108 : vector<1x32x32xbf16> to vector<32x32xbf16>
    %cst_45 = arith.constant dense<0.000000e+00> : vector<8x32xf32>
    %110 = tpu.matmul %107, %109, %cst_45 {dimension_numbers = #tpu.dot_dimension_numbers<[1], [0], [0], [1], [0, 0, 1, 1], [], []>} : vector<8x32xbf16>, vector<32x32xbf16>, vector<8x32xf32> -> vector<8x32xf32>
    %c3_46 = arith.constant 3 : index
    %c0_47 = arith.constant 0 : index
    %c0_48 = arith.constant 0 : index
    %111 = vector.load %arg4[%c3_46, %c0_47, %c0_48] : memref<4x1x32xf32, #tpu.memory_space<vmem>>, vector<1x1x32xf32>
    %112 = vector.shape_cast %111 : vector<1x1x32xf32> to vector<1x32xf32>
    %113 = vector.broadcast %112 : vector<1x32xf32> to vector<8x32xf32>
    %114 = arith.addf %110, %113 : vector<8x32xf32>
    %c0_49 = arith.constant 0 : index
    %c0_50 = arith.constant 0 : index
    %c0_51 = arith.constant 0 : index
    %115 = vector.load %arg5[%c0_49, %c0_50, %c0_51] : memref<1x8x32xf32, #tpu.memory_space<vmem>>, vector<1x8x32xf32>
    %116 = vector.shape_cast %115 : vector<1x8x32xf32> to vector<8x32xf32>
    %117 = vector.shape_cast %114 : vector<8x32xf32> to vector<1x8x32xf32>
    tpu.vector_store %arg5[%c0_49, %c0_50, %c0_51], %117 {strides = array<i32>} : memref<1x8x32xf32, #tpu.memory_space<vmem>>, vector<1x8x32xf32>,
    return
  }
  func.func @transform_0(%arg0: i32, %arg1: i32) -> (i32, i32, i32) {
    %c0_i32 = arith.constant 0 : i32
    %c0_i32_0 = arith.constant 0 : i32
    %c0_i32_1 = arith.constant 0 : i32
    return %arg0, %c0_i32, %c0_i32_0 : i32, i32, i32
  }
  func.func @transform_1(%arg0: i32, %arg1: i32) -> (i32, i32, i32) {
    %c0_i32 = arith.constant 0 : i32
    %c0_i32_0 = arith.constant 0 : i32
    %c0_i32_1 = arith.constant 0 : i32
    %c0_i32_2 = arith.constant 0 : i32
    return %c0_i32, %c0_i32_0, %c0_i32_1 : i32, i32, i32
  }
  func.func @transform_2(%arg0: i32, %arg1: i32) -> (i32, i32, i32) {
    %c0_i32 = arith.constant 0 : i32
    %c0_i32_0 = arith.constant 0 : i32
    %c0_i32_1 = arith.constant 0 : i32
    %c0_i32_2 = arith.constant 0 : i32
    return %c0_i32, %c0_i32_0, %c0_i32_1 : i32, i32, i32
  }
  func.func @transform_3(%arg0: i32, %arg1: i32) -> (i32, i32, i32) {
    %c0_i32 = arith.constant 0 : i32
    %c0_i32_0 = arith.constant 0 : i32
    return %arg0, %arg1, %c0_i32 : i32, i32, i32
  }
}

module attributes {stable_mosaic.version = 11 : i64} {
  func.func @_clip_attn_kernel(%arg0: i32, %arg1: i32, %arg2: memref<1x8x32xbf16, #tpu.memory_space<vmem>>, %arg3: memref<4x32x32xbf16, #tpu.memory_space<vmem>>, %arg4: memref<4x1x32xf32, #tpu.memory_space<vmem>>, %arg5: memref<1x8x32xf32, #tpu.memory_space<vmem>>, %arg6: memref<8x32xbf16, #tpu.memory_space<vmem>>) attributes {dimension_semantics = [#tpu.dimension_semantics<parallel>, #tpu.dimension_semantics<parallel>], iteration_bounds = array<i64: 2, 1>, scalar_prefetch = 0 : i64, scratch_operands = 1 : i64, tpu.core_type = #tpu.core_type<tc>, window_params = [{transform_indices = @transform_0, window_bounds = array<i64: 1, 8, 32>}, {pipeline_mode = #tpu.pipeline_mode<synchronous>, transform_indices = @transform_1, window_bounds = array<i64: 4, 32, 32>}, {pipeline_mode = #tpu.pipeline_mode<synchronous>, transform_indices = @transform_2, window_bounds = array<i64: 4, 1, 32>}, {transform_indices = @transform_3, window_bounds = array<i64: 1, 8, 32>}]} {
    %c0 = arith.constant 0 : index
    %c0_0 = arith.constant 0 : index
    %c0_1 = arith.constant 0 : index
    %0 = vector.load %arg2[%c0, %c0_0, %c0_1] : memref<1x8x32xbf16, #tpu.memory_space<vmem>>, vector<1x8x32xbf16>
    %1 = vector.shape_cast %0 : vector<1x8x32xbf16> to vector<8x32xbf16>
    %c0_2 = arith.constant 0 : index
    %c0_3 = arith.constant 0 : index
    %c0_4 = arith.constant 0 : index
    %2 = vector.load %arg3[%c0_2, %c0_3, %c0_4] : memref<4x32x32xbf16, #tpu.memory_space<vmem>>, vector<1x32x32xbf16>
    %3 = vector.shape_cast %2 : vector<1x32x32xbf16> to vector<32x32xbf16>
    %cst = arith.constant dense<0.000000e+00> : vector<8x32xf32>
    %4 = tpu.matmul %1, %3, %cst {dimension_numbers = #tpu.dot_dimension_numbers<[1], [0], [0], [1], [0, 0, 1, 1], [], []>} : vector<8x32xbf16>, vector<32x32xbf16>, vector<8x32xf32> -> vector<8x32xf32>
    %c0_5 = arith.constant 0 : index
    %c0_6 = arith.constant 0 : index
    %c0_7 = arith.constant 0 : index
    %5 = vector.load %arg4[%c0_5, %c0_6, %c0_7] : memref<4x1x32xf32, #tpu.memory_space<vmem>>, vector<1x1x32xf32>
    %6 = vector.shape_cast %5 : vector<1x1x32xf32> to vector<1x32xf32>
    %7 = vector.broadcast %6 : vector<1x32xf32> to vector<8x32xf32>
    %8 = arith.addf %4, %7 : vector<8x32xf32>
    %c1 = arith.constant 1 : index
    %c0_8 = arith.constant 0 : index
    %c0_9 = arith.constant 0 : index
    %9 = vector.load %arg3[%c1, %c0_8, %c0_9] : memref<4x32x32xbf16, #tpu.memory_space<vmem>>, vector<1x32x32xbf16>
    %10 = vector.shape_cast %9 : vector<1x32x32xbf16> to vector<32x32xbf16>
    %cst_10 = arith.constant dense<0.000000e+00> : vector<8x32xf32>
    %11 = tpu.matmul %1, %10, %cst_10 {dimension_numbers = #tpu.dot_dimension_numbers<[1], [0], [0], [1], [0, 0, 1, 1], [], []>} : vector<8x32xbf16>, vector<32x32xbf16>, vector<8x32xf32> -> vector<8x32xf32>
    %c1_11 = arith.constant 1 : index
    %c0_12 = arith.constant 0 : index
    %c0_13 = arith.constant 0 : index
    %12 = vector.load %arg4[%c1_11, %c0_12, %c0_13] : memref<4x1x32xf32, #tpu.memory_space<vmem>>, vector<1x1x32xf32>
    %13 = vector.shape_cast %12 : vector<1x1x32xf32> to vector<1x32xf32>
    %14 = vector.broadcast %13 : vector<1x32xf32> to vector<8x32xf32>
    %15 = arith.addf %11, %14 : vector<8x32xf32>
    %c2 = arith.constant 2 : index
    %c0_14 = arith.constant 0 : index
    %c0_15 = arith.constant 0 : index
    %16 = vector.load %arg3[%c2, %c0_14, %c0_15] : memref<4x32x32xbf16, #tpu.memory_space<vmem>>, vector<1x32x32xbf16>
    %17 = vector.shape_cast %16 : vector<1x32x32xbf16> to vector<32x32xbf16>
    %cst_16 = arith.constant dense<0.000000e+00> : vector<8x32xf32>
    %18 = tpu.matmul %1, %17, %cst_16 {dimension_numbers = #tpu.dot_dimension_numbers<[1], [0], [0], [1], [0, 0, 1, 1], [], []>} : vector<8x32xbf16>, vector<32x32xbf16>, vector<8x32xf32> -> vector<8x32xf32>
    %c2_17 = arith.constant 2 : index
    %c0_18 = arith.constant 0 : index
    %c0_19 = arith.constant 0 : index
    %19 = vector.load %arg4[%c2_17, %c0_18, %c0_19] : memref<4x1x32xf32, #tpu.memory_space<vmem>>, vector<1x1x32xf32>
    %20 = vector.shape_cast %19 : vector<1x1x32xf32> to vector<1x32xf32>
    %21 = vector.broadcast %20 : vector<1x32xf32> to vector<8x32xf32>
    %22 = arith.addf %18, %21 : vector<8x32xf32>
    %23 = vector.extract_strided_slice %8 {offsets = [0, 0], sizes = [8, 8], strides = [1, 1]} : vector<8x32xf32> to vector<8x8xf32>
    %24 = arith.truncf %23 : vector<8x8xf32> to vector<8x8xbf16>
    %25 = vector.extract_strided_slice %15 {offsets = [0, 0], sizes = [8, 8], strides = [1, 1]} : vector<8x32xf32> to vector<8x8xf32>
    %26 = arith.truncf %25 : vector<8x8xf32> to vector<8x8xbf16>
    %27 = vector.extract_strided_slice %22 {offsets = [0, 0], sizes = [8, 8], strides = [1, 1]} : vector<8x32xf32> to vector<8x8xf32>
    %28 = arith.truncf %27 : vector<8x8xf32> to vector<8x8xbf16>
    %cst_20 = arith.constant dense<0.000000e+00> : vector<8x8xf32>
    %29 = tpu.matmul %24, %26, %cst_20 {dimension_numbers = #tpu.dot_dimension_numbers<[1], [1], [0], [0], [0, 0, 1, 0], [], []>} : vector<8x8xbf16>, vector<8x8xbf16>, vector<8x8xf32> -> vector<8x8xf32>
    %cst_21 = arith.constant dense<0xFF800000> : vector<8xf32>
    %30 = vector.multi_reduction <maximumf>, %29, %cst_21 [1] : vector<8x8xf32> to vector<8xf32>
    %31 = vector.shape_cast %30 : vector<8xf32> to vector<8x1xf32>
    %32 = vector.broadcast %31 : vector<8x1xf32> to vector<8x8xf32>
    %33 = arith.subf %29, %32 : vector<8x8xf32>
    %34 = math.exp %33 : vector<8x8xf32>
    %cst_22 = arith.constant dense<0.000000e+00> : vector<8xf32>
    %35 = vector.multi_reduction <add>, %34, %cst_22 [1] : vector<8x8xf32> to vector<8xf32>
    %36 = vector.shape_cast %35 : vector<8xf32> to vector<8x1xf32>
    %37 = arith.truncf %34 : vector<8x8xf32> to vector<8x8xbf16>
    %cst_23 = arith.constant dense<0.000000e+00> : vector<8x8xf32>
    %38 = tpu.matmul %37, %28, %cst_23 {dimension_numbers = #tpu.dot_dimension_numbers<[1], [0], [0], [1], [0, 0, 1, 1], [], []>} : vector<8x8xbf16>, vector<8x8xbf16>, vector<8x8xf32> -> vector<8x8xf32>
    %39 = tpu.reciprocal %36 {approx = true} : vector<8x1xf32> -> vector<8x1xf32>
    %40 = vector.broadcast %39 : vector<8x1xf32> to vector<8x8xf32>
    %41 = arith.mulf %38, %40 : vector<8x8xf32>
    %42 = arith.truncf %41 : vector<8x8xf32> to vector<8x8xbf16>
    %c0_24 = arith.constant 0 : index
    %c0_25 = arith.constant 0 : index
    %43 = vector.load %arg6[%c0_24, %c0_25] : memref<8x32xbf16, #tpu.memory_space<vmem>>, vector<8x8xbf16>
    tpu.vector_store %arg6[%c0_24, %c0_25], %42 {strides = array<i32>} : memref<8x32xbf16, #tpu.memory_space<vmem>>, vector<8x8xbf16>,
    %44 = vector.extract_strided_slice %8 {offsets = [0, 8], sizes = [8, 8], strides = [1, 1]} : vector<8x32xf32> to vector<8x8xf32>
    %45 = arith.truncf %44 : vector<8x8xf32> to vector<8x8xbf16>
    %46 = vector.extract_strided_slice %15 {offsets = [0, 8], sizes = [8, 8], strides = [1, 1]} : vector<8x32xf32> to vector<8x8xf32>
    %47 = arith.truncf %46 : vector<8x8xf32> to vector<8x8xbf16>
    %48 = vector.extract_strided_slice %22 {offsets = [0, 8], sizes = [8, 8], strides = [1, 1]} : vector<8x32xf32> to vector<8x8xf32>
    %49 = arith.truncf %48 : vector<8x8xf32> to vector<8x8xbf16>
    %cst_26 = arith.constant dense<0.000000e+00> : vector<8x8xf32>
    %50 = tpu.matmul %45, %47, %cst_26 {dimension_numbers = #tpu.dot_dimension_numbers<[1], [1], [0], [0], [0, 0, 1, 0], [], []>} : vector<8x8xbf16>, vector<8x8xbf16>, vector<8x8xf32> -> vector<8x8xf32>
    %cst_27 = arith.constant dense<0xFF800000> : vector<8xf32>
    %51 = vector.multi_reduction <maximumf>, %50, %cst_27 [1] : vector<8x8xf32> to vector<8xf32>
    %52 = vector.shape_cast %51 : vector<8xf32> to vector<8x1xf32>
    %53 = vector.broadcast %52 : vector<8x1xf32> to vector<8x8xf32>
    %54 = arith.subf %50, %53 : vector<8x8xf32>
    %55 = math.exp %54 : vector<8x8xf32>
    %cst_28 = arith.constant dense<0.000000e+00> : vector<8xf32>
    %56 = vector.multi_reduction <add>, %55, %cst_28 [1] : vector<8x8xf32> to vector<8xf32>
    %57 = vector.shape_cast %56 : vector<8xf32> to vector<8x1xf32>
    %58 = arith.truncf %55 : vector<8x8xf32> to vector<8x8xbf16>
    %cst_29 = arith.constant dense<0.000000e+00> : vector<8x8xf32>
    %59 = tpu.matmul %58, %49, %cst_29 {dimension_numbers = #tpu.dot_dimension_numbers<[1], [0], [0], [1], [0, 0, 1, 1], [], []>} : vector<8x8xbf16>, vector<8x8xbf16>, vector<8x8xf32> -> vector<8x8xf32>
    %60 = tpu.reciprocal %57 {approx = true} : vector<8x1xf32> -> vector<8x1xf32>
    %61 = vector.broadcast %60 : vector<8x1xf32> to vector<8x8xf32>
    %62 = arith.mulf %59, %61 : vector<8x8xf32>
    %63 = arith.truncf %62 : vector<8x8xf32> to vector<8x8xbf16>
    %c0_30 = arith.constant 0 : index
    %c8 = arith.constant 8 : index
    %64 = vector.load %arg6[%c0_30, %c8] : memref<8x32xbf16, #tpu.memory_space<vmem>>, vector<8x8xbf16>
    tpu.vector_store %arg6[%c0_30, %c8], %63 {strides = array<i32>} : memref<8x32xbf16, #tpu.memory_space<vmem>>, vector<8x8xbf16>,
    %65 = vector.extract_strided_slice %8 {offsets = [0, 16], sizes = [8, 8], strides = [1, 1]} : vector<8x32xf32> to vector<8x8xf32>
    %66 = arith.truncf %65 : vector<8x8xf32> to vector<8x8xbf16>
    %67 = vector.extract_strided_slice %15 {offsets = [0, 16], sizes = [8, 8], strides = [1, 1]} : vector<8x32xf32> to vector<8x8xf32>
    %68 = arith.truncf %67 : vector<8x8xf32> to vector<8x8xbf16>
    %69 = vector.extract_strided_slice %22 {offsets = [0, 16], sizes = [8, 8], strides = [1, 1]} : vector<8x32xf32> to vector<8x8xf32>
    %70 = arith.truncf %69 : vector<8x8xf32> to vector<8x8xbf16>
    %cst_31 = arith.constant dense<0.000000e+00> : vector<8x8xf32>
    %71 = tpu.matmul %66, %68, %cst_31 {dimension_numbers = #tpu.dot_dimension_numbers<[1], [1], [0], [0], [0, 0, 1, 0], [], []>} : vector<8x8xbf16>, vector<8x8xbf16>, vector<8x8xf32> -> vector<8x8xf32>
    %cst_32 = arith.constant dense<0xFF800000> : vector<8xf32>
    %72 = vector.multi_reduction <maximumf>, %71, %cst_32 [1] : vector<8x8xf32> to vector<8xf32>
    %73 = vector.shape_cast %72 : vector<8xf32> to vector<8x1xf32>
    %74 = vector.broadcast %73 : vector<8x1xf32> to vector<8x8xf32>
    %75 = arith.subf %71, %74 : vector<8x8xf32>
    %76 = math.exp %75 : vector<8x8xf32>
    %cst_33 = arith.constant dense<0.000000e+00> : vector<8xf32>
    %77 = vector.multi_reduction <add>, %76, %cst_33 [1] : vector<8x8xf32> to vector<8xf32>
    %78 = vector.shape_cast %77 : vector<8xf32> to vector<8x1xf32>
    %79 = arith.truncf %76 : vector<8x8xf32> to vector<8x8xbf16>
    %cst_34 = arith.constant dense<0.000000e+00> : vector<8x8xf32>
    %80 = tpu.matmul %79, %70, %cst_34 {dimension_numbers = #tpu.dot_dimension_numbers<[1], [0], [0], [1], [0, 0, 1, 1], [], []>} : vector<8x8xbf16>, vector<8x8xbf16>, vector<8x8xf32> -> vector<8x8xf32>
    %81 = tpu.reciprocal %78 {approx = true} : vector<8x1xf32> -> vector<8x1xf32>
    %82 = vector.broadcast %81 : vector<8x1xf32> to vector<8x8xf32>
    %83 = arith.mulf %80, %82 : vector<8x8xf32>
    %84 = arith.truncf %83 : vector<8x8xf32> to vector<8x8xbf16>
    %c0_35 = arith.constant 0 : index
    %c16 = arith.constant 16 : index
    %85 = vector.load %arg6[%c0_35, %c16] : memref<8x32xbf16, #tpu.memory_space<vmem>>, vector<8x8xbf16>
    tpu.vector_store %arg6[%c0_35, %c16], %84 {strides = array<i32>} : memref<8x32xbf16, #tpu.memory_space<vmem>>, vector<8x8xbf16>,
    %86 = vector.extract_strided_slice %8 {offsets = [0, 24], sizes = [8, 8], strides = [1, 1]} : vector<8x32xf32> to vector<8x8xf32>
    %87 = arith.truncf %86 : vector<8x8xf32> to vector<8x8xbf16>
    %88 = vector.extract_strided_slice %15 {offsets = [0, 24], sizes = [8, 8], strides = [1, 1]} : vector<8x32xf32> to vector<8x8xf32>
    %89 = arith.truncf %88 : vector<8x8xf32> to vector<8x8xbf16>
    %90 = vector.extract_strided_slice %22 {offsets = [0, 24], sizes = [8, 8], strides = [1, 1]} : vector<8x32xf32> to vector<8x8xf32>
    %91 = arith.truncf %90 : vector<8x8xf32> to vector<8x8xbf16>
    %cst_36 = arith.constant dense<0.000000e+00> : vector<8x8xf32>
    %92 = tpu.matmul %87, %89, %cst_36 {dimension_numbers = #tpu.dot_dimension_numbers<[1], [1], [0], [0], [0, 0, 1, 0], [], []>} : vector<8x8xbf16>, vector<8x8xbf16>, vector<8x8xf32> -> vector<8x8xf32>
    %cst_37 = arith.constant dense<0xFF800000> : vector<8xf32>
    %93 = vector.multi_reduction <maximumf>, %92, %cst_37 [1] : vector<8x8xf32> to vector<8xf32>
    %94 = vector.shape_cast %93 : vector<8xf32> to vector<8x1xf32>
    %95 = vector.broadcast %94 : vector<8x1xf32> to vector<8x8xf32>
    %96 = arith.subf %92, %95 : vector<8x8xf32>
    %97 = math.exp %96 : vector<8x8xf32>
    %cst_38 = arith.constant dense<0.000000e+00> : vector<8xf32>
    %98 = vector.multi_reduction <add>, %97, %cst_38 [1] : vector<8x8xf32> to vector<8xf32>
    %99 = vector.shape_cast %98 : vector<8xf32> to vector<8x1xf32>
    %100 = arith.truncf %97 : vector<8x8xf32> to vector<8x8xbf16>
    %cst_39 = arith.constant dense<0.000000e+00> : vector<8x8xf32>
    %101 = tpu.matmul %100, %91, %cst_39 {dimension_numbers = #tpu.dot_dimension_numbers<[1], [0], [0], [1], [0, 0, 1, 1], [], []>} : vector<8x8xbf16>, vector<8x8xbf16>, vector<8x8xf32> -> vector<8x8xf32>
    %102 = tpu.reciprocal %99 {approx = true} : vector<8x1xf32> -> vector<8x1xf32>
    %103 = vector.broadcast %102 : vector<8x1xf32> to vector<8x8xf32>
    %104 = arith.mulf %101, %103 : vector<8x8xf32>
    %105 = arith.truncf %104 : vector<8x8xf32> to vector<8x8xbf16>
    %c0_40 = arith.constant 0 : index
    %c24 = arith.constant 24 : index
    %106 = vector.load %arg6[%c0_40, %c24] : memref<8x32xbf16, #tpu.memory_space<vmem>>, vector<8x8xbf16>
    tpu.vector_store %arg6[%c0_40, %c24], %105 {strides = array<i32>} : memref<8x32xbf16, #tpu.memory_space<vmem>>, vector<8x8xbf16>,
    %c0_41 = arith.constant 0 : index
    %c0_42 = arith.constant 0 : index
    %107 = vector.load %arg6[%c0_41, %c0_42] : memref<8x32xbf16, #tpu.memory_space<vmem>>, vector<8x32xbf16>
    %c3 = arith.constant 3 : index
    %c0_43 = arith.constant 0 : index
    %c0_44 = arith.constant 0 : index
    %108 = vector.load %arg3[%c3, %c0_43, %c0_44] : memref<4x32x32xbf16, #tpu.memory_space<vmem>>, vector<1x32x32xbf16>
    %109 = vector.shape_cast %108 : vector<1x32x32xbf16> to vector<32x32xbf16>
    %cst_45 = arith.constant dense<0.000000e+00> : vector<8x32xf32>
    %110 = tpu.matmul %107, %109, %cst_45 {dimension_numbers = #tpu.dot_dimension_numbers<[1], [0], [0], [1], [0, 0, 1, 1], [], []>} : vector<8x32xbf16>, vector<32x32xbf16>, vector<8x32xf32> -> vector<8x32xf32>
    %c3_46 = arith.constant 3 : index
    %c0_47 = arith.constant 0 : index
    %c0_48 = arith.constant 0 : index
    %111 = vector.load %arg4[%c3_46, %c0_47, %c0_48] : memref<4x1x32xf32, #tpu.memory_space<vmem>>, vector<1x1x32xf32>
    %112 = vector.shape_cast %111 : vector<1x1x32xf32> to vector<1x32xf32>
    %113 = vector.broadcast %112 : vector<1x32xf32> to vector<8x32xf32>
    %114 = arith.addf %110, %113 : vector<8x32xf32>
    %c0_49 = arith.constant 0 : index
    %c0_50 = arith.constant 0 : index
    %c0_51 = arith.constant 0 : index
    %115 = vector.load %arg5[%c0_49, %c0_50, %c0_51] : memref<1x8x32xf32, #tpu.memory_space<vmem>>, vector<1x8x32xf32>
    %116 = vector.shape_cast %115 : vector<1x8x32xf32> to vector<8x32xf32>
    %117 = vector.shape_cast %114 : vector<8x32xf32> to vector<1x8x32xf32>
    tpu.vector_store %arg5[%c0_49, %c0_50, %c0_51], %117 {strides = array<i32>} : memref<1x8x32xf32, #tpu.memory_space<vmem>>, vector<1x8x32xf32>,
    return
  }
  func.func @transform_0(%arg0: i32, %arg1: i32) -> (i32, i32, i32) {
    %c0_i32 = arith.constant 0 : i32
    %c0_i32_0 = arith.constant 0 : i32
    %c0_i32_1 = arith.constant 0 : i32
    return %arg0, %c0_i32, %c0_i32_0 : i32, i32, i32
  }
  func.func @transform_1(%arg0: i32, %arg1: i32) -> (i32, i32, i32) {
    %c0_i32 = arith.constant 0 : i32
    %c0_i32_0 = arith.constant 0 : i32
    %c0_i32_1 = arith.constant 0 : i32
    %c0_i32_2 = arith.constant 0 : i32
    return %c0_i32, %c0_i32_0, %c0_i32_1 : i32, i32, i32
  }
  func.func @transform_2(%arg0: i32, %arg1: i32) -> (i32, i32, i32) {
    %c0_i32 = arith.constant 0 : i32
    %c0_i32_0 = arith.constant 0 : i32
    %c0_i32_1 = arith.constant 0 : i32
    %c0_i32_2 = arith.constant 0 : i32
    return %c0_i32, %c0_i32_0, %c0_i32_1 : i32, i32, i32
  }
  func.func @transform_3(%arg0: i32, %arg1: i32) -> (i32, i32, i32) {
    %c0_i32 = arith.constant 0 : i32
    %c0_i32_0 = arith.constant 0 : i32
    return %arg0, %arg1, %c0_i32 : i32, i32, i32
  }
}

</mosaic_0001>

<bundles_post_ra>
// kernel: tpu_custom_call.1
= control target key start
LH: loop header
LB: loop body
LE: loop exit
PB: predicated region body
PF: predicated region fallthrough
CT: control target
= control target key end

     0   :  { %8 = vsyncpa [#allocation4], 0  ;;  %s1321_s0 = inlined_call_operand.hbm [shape: bf16[2,8,32], index: 0, kind: input, shape index: {}]   ;;  %s1322_s1 = inlined_call_operand.hbm [shape: bf16[4,32,32], index: 1, kind: input, shape index: {}]   ;;  %s1323_s2 = inlined_call_operand.hbm [shape: f32[4,1,32], index: 2, kind: input, shape index: {}]   ;;  %s1324_s3 = inlined_call_operand.hbm [shape: f32[2,8,32], index: 3, kind: output, shape index: {}]  }
   0x1   :  { %10 = vsyncpa [#allocation4 + $0x1], 0 }
   0x2   :  { %11 = vsyncpa [#allocation7], 0 }
   0x3   :  { %12 = vsyncpa [#allocation5], 0 }
   0x4   :  { %14 = vsyncpa [#allocation5 + $0x1], 0  ;;  %s1141_s12 = smov 0   ;;  %s1143_s13 = smov 0  }
   0x5   :  { %s1145_s14 = smov 0   ;;  %s1147_s15 = smov 0  }
   0x6   :  { %s1149_s16 = smov 0   ;;  %s1151_s17 = smov 0  }
   0x7 LB: > { %s749_s18 = sadd.s32 4294967295, %s1107_s17   ;;  %p751_p0 = scmp.ge.s32.totalorder %s1107_s17, 1  ;;  %s1107_s17 = sphi %s1151_s17, %s20_s17   ;;  %s1103_s16 = sphi %s1149_s16, %s1334_s16   ;;  %s1099_s15 = sphi %s1147_s15, %s1333_s15   ;;  %s1095_s14 = sphi %s1145_s14, %s1332_s14   ;;  %s1091_s13 = sphi %s1143_s13, %s1331_s13   ;;  %s1087_s12 = sphi %s1141_s12, %s1330_s12  }
   0x8   : > { %p1175_p1 = scmp.eq.s32.totalorder %s749_s18, 0  ;;  %p133_p2 = scmp.lt.s32.totalorder %s1107_s17, 3 }
   0x9   : > { %s144_s22 = sshll.u32 %s1322_s1, 4  ;;  %s1109_s24 = smov [#allocation6]   ;;  %s145_s22 = int_to_ptr.hbm [resolvable:$true] %s144_s22 }
   0xa   : > { %p1183_p3 = pnand %p751_p0, %p133_p2  ;;  %s146_s25 = sshll.u32 %s1109_s24, 4  ;;  %s147_s25 = int_to_ptr.vmem [resolvable:$true] %s146_s25 }
   0xb   : > { %p754_p6 = scmp.ge.s32.totalorder %s1107_s17, 2  ;;  %s158_s28 = sshll.u32 %s1323_s2, 4  ;;  %s159_s28 = int_to_ptr.hbm [resolvable:$true] %s158_s28 }
   0xc   : > { %p830_p4 = pneg %p1183_p3  ;;  %s1110_s29 = smov 64  }
   0xd   : > { %s1111_s30 = smov 4   ;;  %s1112_s4 = smov [#allocation8]  }
   0xe   : > { %p831_p5 = pnand %p830_p4, %p1175_p1  ;;  %s160_s5 = sshll.u32 %s1112_s4, 4  ;;  %s161_s5 = int_to_ptr.vmem [resolvable:$true] %s160_s5 }
   0xf   : > { %s1113_s6 = smov 16   ;;  %s1114_s7 = smov 1  }
  0x10   : > { %833 = dma.hbm_to_vmem [thread:$0]  (!%p831_p5), %s145_s22, 1024, %s147_s25, [#allocation7], %s1110_s29, %s1110_s29, %s1111_s30  }
  0x11   : > { %836 = dma.hbm_to_vmem [thread:$0]  (!%p831_p5), %s159_s28, 64, %s161_s5, [#allocation7], %s1113_s6, %s1113_s6, %s1114_s7  }
  0x12   : > { %s32_s8 = sadd.s32 1, %s1103_s16  ;;  %s750_s9 = sadd.s32 4294967294, %s1107_s17  }
  0x13   : > { %p34_p7 = scmp.ge.s32.totalorder %s32_s8, 2  ;;  %s39_s10 = sadd.s32 1, %s1095_s14 }
  0x14   : > { %p46_p8 = scmp.ne.s32.totalorder %s1095_s14, %s1091_s13  ;;  %p47_p9 = scmp.eq.s32.totalorder %s1107_s17, 0 }
  0x15   : > { %s1336_s8 = smov (%p34_p7, %s32_s8), 0  ;;  %p52_p10 = scmp.ne.s32.totalorder %s1091_s13, %s1087_s12 }
  0x16   : > { %s36_s11 = ssub.s32 %s1103_s16, %s1336_s8  ;;  %p120_p11 = scmp.eq.s32.totalorder %s749_s18, 1 }
  0x17   : > { %p37_p12 = scmp.eq.s32.totalorder %s36_s11, 0  ;;  %p1211_p13 = por %p1175_p1, %p52_p10 }
  0x18   : > { %p1215_p0 = por %p120_p11, %p46_p8  ;;  %p126_p2 = scmp.eq.s32.totalorder %s750_s9, 1 }
  0x19   : > { %s1220_s22 = scalar_select %p37_p12, %s1095_s14, %s39_s10  }
  0x1a   : > { %p48_p4 = por %p47_p9, %p46_p8  ;;  %p1222_p5 = por %p126_p2, %p52_p10 }
  0x1b   : > { %s174_s25 = sand.u32 1, %s1095_s14   ;;  %s756_s18 = sshll.u32 %s1103_s16, 2 }
  0x1c   : > { %p847_p7 = scmp.lt.s32.totalorder %s1107_s17, 2  ;;  %s755_s26 = sshll.u32 %s174_s25, 2 }
  0x1d   : > { %s182_s29 = scalar_lea.hbm %s1321_s0, %s756_s18  ;;  %s178_s4 = scalar_lea.vmem [#allocation3], %s755_s26 }
  0x1e   : > { %s184_s30 = sshll.u32 %s182_s29, 4  ;;  %s186_s5 = sshll.u32 %s178_s4, 4  ;;  %s185_s30 = int_to_ptr.hbm [resolvable:$true] %s184_s30  ;;  %s187_s5 = int_to_ptr.vmem [resolvable:$true] %s186_s5 }
  0x1f   : > { %p838_p11 = pnand %p847_p7, %p48_p4  ;;  %s175_s6 = scalar_lea.sflag [#allocation4], %s174_s25 }
  0x20   : > { %195 = sbr.rel (%p1183_p3) target bundleno = 966 (0x3c6), region = 32  ;;  %s1235_s7 = sand.u32 (!%p1183_p3), 1, %s1091_s13  }
  0x21   : > { %840 = dma.hbm_to_vmem [thread:$0]  (!%p838_p11), %s185_s30, 64, %s187_s5, %s175_s6  }
  0x22   : > { %s758_s9 = sshll.u32 (!%p1183_p3), %s1235_s7, 2  ;;  %s198_s10 = scalar_lea.sflag (!%p1183_p3), [#allocation4], %s1235_s7 }
  0x23   : > { %s201_s11 = scalar_lea.vmem (!%p1183_p3), [#allocation3], %s758_s9 }
  0x25   : > { %1074 = dma.done.wait (%p1211_p13), %s198_s10, 64  }
  0x26   : > { %1076 = vsyncadd (%p1211_p13), %s198_s10, 4294967232 }
  0x27   : > { %1078 = dma.done.wait (%p1175_p1), [#allocation7], 1088  }
  0x28   : > { %1080 = vsyncadd (%p1175_p1), [#allocation7], 4294966208  ;;  %v811_v0 = vld [vmem:[#allocation6 + $0x8] sm:$0xff]  ;;  %v813_v1 = vld [vmem:[#allocation6 + $0x18] sm:$0xff]  ;;  %vm257_vm0 = vcmask 261120   ;;  %vm347_vm1 = vcmask 64512  }
  0x29   : > { %v810_v2 = vld [vmem:[#allocation6] sm:$0xff]  ;;  %267 = vmatpush.bf16.msra.mxu0 %v811_v0  ;;  %302 = vmatpush.bf16.msra.mxu1 %v813_v1  ;;  %v812_v3 = vld [vmem:[#allocation6 + $0x10] sm:$0xff]  ;;  %v236_v4 = vld [vmem:[%s201_s11] sm:$0xf]  ;;  %s1115_s19 = smov 112   ;;  %s1116_s23 = smov 120  }
  0x2a   : > { %v815_v5 = vld [vmem:[#allocation6 + $0x28] sm:$0xff]  ;;  %v814_v6 = vld [vmem:[#allocation6 + $0x20] sm:$0xff]  ;;  %s1117_s20 = smov 104   ;;  %vm380_vm2 = vcmask 1043456   ;;  %vm400_vm3 = vcmask 60416   ;;  %s1118_s25 = smov 8  }
  0x2b   : > { %337 = vmatpush.bf16.msra.mxu2 %v815_v5  ;;  %v911_v7 = vld [vmem:[#allocation8] ss:$0 sm:$0xff]  ;;  %v912_v8 = vld [vmem:[#allocation8 + $0x1] ss:$0 sm:$0xff]  ;;  %v913_v22 = vld [vmem:[#allocation8 + $0x2] ss:$0 sm:$0xff] }
  0x2c   : > { %s1119_s18 = smov 16   ;;  %s1120_s26 = smov 24   ;;  %vm466_vm4 = vcmask 126016   ;;  %vm529_vm5 = vcmask 191616   ;;  %vm592_vm6 = vcmask 257216  }
  0x2d   : > { %268 = vmatpush.bf16.msra.mxu0 %v810_v2  ;;  %303 = vmatpush.bf16.msra.mxu1 %v812_v3  ;;  %s807_s27 = sshll.u32 %s1099_s15, 3  ;;  %s761_s28 = sshll.u32 %s1235_s7, 3 }
  0x2e   : > { %s646_s4 = scalar_lea.hbm %s1324_s3, %s807_s27  ;;  %s234_s5 = scalar_lea.vmem [#allocation9], %s761_s28 }
  0x2f   : > { %338 = vmatpush.bf16.msra.mxu2 %v814_v6  ;;  %s648_s6 = sshll.u32 %s234_s5, 4  ;;  %s650_s9 = sshll.u32 %s646_s4, 4  ;;  %s649_s6 = int_to_ptr.vmem [resolvable:$true] %s648_s6  ;;  %s651_s9 = int_to_ptr.hbm [resolvable:$true] %s650_s9 }
  0x30   : > { %770 = vmatmul.msk.bf16.vlgmr.msra.gmra.mxu0 %vm257_vm0, %v236_v4  ;;  %779 = vmatmul.msk.bf16.vlgmr.msra.gmra.mxu1 %vm257_vm0, %v236_v4  ;;  %s635_s10 = scalar_lea.sflag [#allocation5], %s1235_s7  ;;  %s1035_s11 = sshra.s32 %s651_s9, 4  ;;  %s1036_s11 = int_to_ptr.hbm [resolvable:$true] %s1035_s11 }
  0x31   : > { %s1037_s15 = scalar_lea.hbm %s1036_s11, 8  ;;  %p1042_p9 = scmp.lt.s32.totalorder %s1036_s11, %s1324_s3 }
  0x32   : > { %788 = vmatmul.msk.bf16.vlgmr.msra.gmra.mxu2 %vm257_vm0, %v236_v4  ;;  %p1038_p1 = scmp.ne.s32.totalorder %s1036_s11, %s1037_s15 }
  0x34   : > { %p1039_p3 = pnand %p1038_p1, %p1215_p0 }
  0x36   : > { %p1040_p8 = pneg %p1039_p3 }
  0xad   : > { %v270_v9 = vpop.f32.mrf.mxu0  ;;  %v305_v10 = vpop.f32.mrf.mxu1 }
  0xae   : > { %v271_v11 = vadd.f32 %v911_v7, %v270_v9  ;;  %v306_v12 = vadd.f32 %v912_v8, %v305_v10 }
  0xb0   : > { %v344_v13 = vpack.c.bf16 %v271_v11, %v271_v11  ;;  %v345_v14 = vpack.c.bf16 %v306_v12, %v306_v12 }
  0xb2   : > { %470 = vrot.lane.b32.xlu1 %v345_v14, %s1115_s19  ;;  %406 = vrot.lane.b32.xlu0 %v345_v14, %s1116_s23  ;;  %v352_v15 = vsel %vm347_vm1, %v345_v14, 0 }
  0xb3   : > { %468 = vrot.lane.b32.xlu2 %v344_v13, %s1115_s19  ;;  %361 = vmatpush.bf16.xpose.msra.mxu3 %v352_v15 }
  0xb5   : > { %v272_v16 = vpop.f32.mrf.mxu0  ;;  %v307_v17 = vpop.f32.mrf.mxu1 }
  0xb6   : > { %v340_v23 = vpop.f32.mrf.mxu2 }
  0xb7   : > { %v341_v24 = vadd.f32 %v913_v22, %v340_v23 }
  0xb9   : > { %v346_v25 = vpack.c.bf16 %v341_v24, %v341_v24 }
  0xba   : > { %533 = vrot.lane.b32.xlu1 %v345_v14, %s1117_s20  ;;  %403 = vrot.lane.b32.xlu0 %v344_v13, %s1116_s23 }
  0xbb   : > { %531 = vrot.lane.b32.xlu2 %v344_v13, %s1117_s20  ;;  %789 = vmatmul.msk.bf16.vlgmr.msra.gmra.mxu3 %vm347_vm1, %v344_v13  ;;  %v382_v31 = vsel %vm380_vm2, %v346_v25, 0 }
  0xbc   : > { %391 = vmatpush.bf16.msrb.mxu0 %v382_v31 }
  0xbe   : > { %v342_v30 = vpop.f32.mrf.mxu2 }
  0xc3   : > { %438 = vrot.lane.b32.xlu2 %v346_v25, %s1116_s23 }
 0x10d   : > { %v469_v26 = vpop.permute.xlu2 %468 }
 0x115   : > { %v532_v32 = vpop.permute.xlu2 %531 }
 0x11d   : > { %v439_v43 = vpop.permute.xlu2 %438 }
 0x11e   : > { %v444_v44 = vsel %vm380_vm2, %v439_v43, 0 }
 0x11f   : > { %453 = vmatpush.bf16.msrb.mxu2 %v444_v44 }
 0x124   : > { %v471_v18 = vpop.permute.xlu1 %470  ;;  %v407_v19 = vpop.permute.xlu0 %406 }
 0x125   : > { %v412_v20 = vsel %vm347_vm1, %v407_v19, 0  ;;  %v476_v21 = vsel %vm347_vm1, %v471_v18, 0 }
 0x126   : > { %421 = vmatpush.bf16.xpose.msrb.mxu1 %v412_v20  ;;  %485 = vmatpush.bf16.xpose.msrb.mxu3 %v476_v21 }
 0x12c   : > { %v534_v27 = vpop.permute.xlu1 %533  ;;  %v404_v28 = vpop.permute.xlu0 %403 }
 0x12d   : > { %v539_v29 = vsel %vm347_vm1, %v534_v27, 0  ;;  %791 = vmatmul.msk.bf16.vlgmr.msrb.gmra.mxu1 %vm347_vm1, %v404_v28  ;;  %793 = vmatmul.msk.bf16.vlgmr.msrb.gmra.mxu3 %vm347_vm1, %v469_v26 }
 0x12e   : > { %548 = vmatpush.bf16.xpose.msra.mxu1 %v539_v29 }
 0x13d   : > { %795 = vmatmul.msk.bf16.vlgmr.msra.gmra.mxu1 %vm347_vm1, %v532_v32 }
 0x13e   : > { %v363_v33 = vpop.f32.mrf.mxu3 }
 0x13f   : > { %v367_v34 = vsel %vm347_vm1, %v363_v33, -inf }
 0x140   : > { %368 = vmax.xlane.f32.xlu1 %v367_v34 }
 0x146   : > { %v365_v35 = vpop.f32.mrf.mxu3 }
 0x159   : > { %564 = vrot.lane.b32.xlu1 %v346_v25, %s1117_s20  ;;  %s1041_s20 = scalar_lea.hbm %s1324_s3, 16 }
 0x15a   : > { %p1043_p10 = scmp.lt.s32.totalorder %s1041_s20, %s1037_s15 }
 0x15c   : > { %p1044_p12 = por %p1043_p10, %p1042_p9 }
 0x15e   : > { %p1045_p13 = pnand %p1044_p12, %p1040_p8 }
 0x1aa   : > { %v423_v36 = vpop.f32.mrf.mxu1 }
 0x1ab   : > { %v427_v37 = vsel %vm347_vm1, %v423_v36, -inf }
 0x1ac   : > { %428 = vmax.xlane.f32.xlu0 %v427_v37  ;;  %v816_v37 = vld [vmem:[#allocation6 + $0x30] sm:$0xff] }
 0x1b0   : > { %v487_v38 = vpop.f32.mrf.mxu3 }
 0x1b1   : > { %v491_v41 = vsel %vm347_vm1, %v487_v38, -inf }
 0x1b2   : > { %v425_v39 = vpop.f32.mrf.mxu1 }
 0x1b3   : > { %v369_v40 = vpop.xlane.xlu1 %368 }
 0x1b4   : > { %v370_v42 = vsub.f32 %v363_v33, %v369_v40  ;;  %492 = vmax.xlane.f32.xlu0 %v491_v41  ;;  %v914_v41 = vld [vmem:[#allocation8 + $0x3] ss:$0 sm:$0xff] }
 0x1b6   : > { %v371_v45 = vmul.f32 1.442695, %v370_v42 }
 0x1b8   : > { %915 = vpow2.f32 %v371_v45  ;;  %v489_v46 = vpop.f32.mrf.mxu3 }
 0x1ba   : > { %v550_v47 = vpop.f32.mrf.mxu1 }
 0x1bb   : > { %v554_v48 = vsel %vm347_vm1, %v550_v47, -inf }
 0x1bc   : > { %555 = vmax.xlane.f32.xlu2 %v554_v48 }
 0x1be   : > { %v916_v49 = vpop.eup %915 }
 0x1bf   : > { %v373_v50 = vsel %vm347_vm1, %v916_v49, 0.0  ;;  %v376_v51 = vpack.c.bf16 %v916_v49, %v916_v49 }
 0x1c0   : > { %374 = vadd.xlane.f32.xlu1 %v373_v50 }
 0x1c1   : > { %790 = vmatmul.msk.bf16.vlgmr.msrb.gmra.mxu0 %vm347_vm1, %v376_v51 }
 0x1c2   : > { %v552_v52 = vpop.f32.mrf.mxu1 }
 0x1cb   : > { %v565_v53 = vpop.permute.xlu1 %564 }
 0x1cc   : > { %v570_v54 = vsel %vm380_vm2, %v565_v53, 0 }
 0x1cd   : > { %579 = vmatpush.bf16.msra.mxu2 %v570_v54 }
 0x1d4   : > { %501 = vrot.lane.b32.xlu2 %v346_v25, %s1115_s19 }
 0x21f   : > { %v429_v55 = vpop.xlane.xlu0 %428 }
 0x220   : > { %v430_v56 = vsub.f32 %v423_v36, %v429_v55  ;;  %v817_v36 = vld [vmem:[#allocation6 + $0x38] sm:$0xff] }
 0x221   : > { %626 = vmatpush.bf16.msra.mxu3 %v817_v36 }
 0x222   : > { %v431_v57 = vmul.f32 1.442695, %v430_v56 }
 0x224   : > { %917 = vpow2.f32 %v431_v57 }
 0x225   : > { %627 = vmatpush.bf16.msra.mxu3 %v816_v37 }
 0x227   : > { %v493_v58 = vpop.xlane.xlu0 %492 }
 0x228   : > { %v494_v59 = vsub.f32 %v487_v38, %v493_v58 }
 0x22a   : > { %v918_v60 = vpop.eup %917  ;;  %v495_v61 = vmul.f32 1.442695, %v494_v59 }
 0x22b   : > { %v433_v62 = vsel %vm347_vm1, %v918_v60, 0.0  ;;  %v436_v63 = vpack.c.bf16 %v918_v60, %v918_v60 }
 0x22c   : > { %919 = vpow2.f32 %v495_v61  ;;  %434 = vadd.xlane.f32.xlu0 %v433_v62 }
 0x22d   : > { %792 = vmatmul.msk.bf16.vlgmr.msrb.gmra.mxu2 %vm347_vm1, %v436_v63 }
 0x22f   : > { %v556_v0 = vpop.xlane.xlu2 %555 }
 0x230   : > { %v557_v1 = vsub.f32 %v550_v47, %v556_v0 }
 0x232   : > { %v920_v2 = vpop.eup %919  ;;  %v558_v3 = vmul.f32 1.442695, %v557_v1 }
 0x233   : > { %v497_v4 = vsel %vm347_vm1, %v920_v2, 0.0  ;;  %v375_v5 = vpop.xlane.xlu1 %374  ;;  %v500_v9 = vpack.c.bf16 %v920_v2, %v920_v2 }
 0x234   : > { %921 = vpow2.f32 %v558_v3  ;;  %498 = vadd.xlane.f32.xlu0 %v497_v4 }
 0x235   : > { %923 = vrcp.f32 %v375_v5 }
 0x237   : > { %v502_v6 = vpop.permute.xlu2 %501 }
 0x238   : > { %v507_v7 = vsel %vm380_vm2, %v502_v6, 0 }
 0x239   : > { %516 = vmatpush.bf16.msra.mxu0 %v507_v7 }
 0x23a   : > { %v922_v8 = vpop.eup %921 }
 0x23b   : > { %v563_v10 = vpack.c.bf16 %v922_v8, %v922_v8  ;;  %v560_v11 = vsel %vm347_vm1, %v922_v8, 0.0  ;;  %v924_v12 = vpop.eup %923 }
 0x23c   : > { %794 = vmatmul.msk.bf16.vlgmr.msra.gmra.mxu0 %vm347_vm1, %v500_v9  ;;  %561 = vadd.xlane.f32.xlu0 %v560_v11 }
 0x23d   : > { %796 = vmatmul.msk.bf16.vlgmr.msra.gmra.mxu2 %vm347_vm1, %v563_v10 }
 0x23e   : > { %v393_v13 = vpop.f32.mrf.mxu0 }
 0x23f   : > { %v398_v14 = vmul.f32 %v924_v12, %v393_v13 }
 0x241   : > { %v399_v15 = vpack.c.bf16 %v398_v14, %v398_v14 }
 0x243   : > { %401 = vst.msk [vmem:[#allocation2] sm:$0xf] %vm400_vm3, %v399_v15 }
 0x246   : > { %v395_v16 = vpop.f32.mrf.mxu0 }
 0x29f   : > { %v435_v17 = vpop.xlane.xlu0 %434 }
 0x2a0   : > { %925 = vrcp.f32 %v435_v17 }
 0x2a6   : > { %v926_v19 = vpop.eup %925 }
 0x2a7   : > { %v499_v18 = vpop.xlane.xlu0 %498 }
 0x2a8   : > { %927 = vrcp.f32 %v499_v18 }
 0x2ae   : > { %v928_v25 = vpop.eup %927 }
 0x2af   : > { %v562_v23 = vpop.xlane.xlu0 %561 }
 0x2b0   : > { %v455_v20 = vpop.f32.mrf.mxu2  ;;  %929 = vrcp.f32 %v562_v23 }
 0x2b1   : > { %v460_v21 = vmul.f32 %v926_v19, %v455_v20 }
 0x2b3   : > { %v461_v22 = vpack.c.bf16 %v460_v21, %v460_v21 }
 0x2b5   : > { %463 = vrot.lane.b32.xlu2 %v461_v22, %s1118_s25 }
 0x2b6   : > { %v930_v29 = vpop.eup %929 }
 0x2b8   : > { %v457_v24 = vpop.f32.mrf.mxu2 }
 0x2b9   : > { %v518_v26 = vpop.f32.mrf.mxu0 }
 0x2ba   : > { %v523_v27 = vmul.f32 %v928_v25, %v518_v26 }
 0x2bc   : > { %v524_v28 = vpack.c.bf16 %v523_v27, %v523_v27 }
 0x2be   : > { %526 = vrot.lane.b32.xlu0 %v524_v28, %s1119_s18 }
 0x2c0   : > { %v581_v30 = vpop.f32.mrf.mxu2 }
 0x2c1   : > { %v586_v31 = vmul.f32 %v930_v29, %v581_v30  ;;  %v520_v32 = vpop.f32.mrf.mxu0 }
 0x2c3   : > { %v587_v33 = vpack.c.bf16 %v586_v31, %v586_v31 }
 0x2c5   : > { %589 = vrot.lane.b32.xlu2 %v587_v33, %s1120_s26 }
 0x2c8   : > { %v583_v34 = vpop.f32.mrf.mxu2 }
 0x30f   : > { %v464_v35 = vpop.permute.xlu2 %463 }
 0x310   : > { %467 = vst.msk [vmem:[#allocation2] sm:$0xf] %vm466_vm4, %v464_v35 }
 0x31f   : > { %v590_v39 = vpop.permute.xlu2 %589 }
 0x330   : > { %v527_v38 = vpop.permute.xlu0 %526 }
 0x331   : > { %530 = vst.msk [vmem:[#allocation2] sm:$0xf] %vm529_vm5, %v527_v38 }
 0x332   : > { %593 = vst.msk [vmem:[#allocation2] sm:$0xf] %vm592_vm6, %v590_v39 }
 0x339   : > { %v594_v40 = vld [vmem:[#allocation2] sm:$0xf] }
 0x33a   : > { %805 = vmatmul.msk.bf16.vlgmr.msra.gmra.mxu3 %vm257_vm0, %v594_v40 }
 0x3bd   : > { %v629_v42 = vpop.f32.mrf.mxu3 }
 0x3be   : > { %v630_v43 = vadd.f32 %v914_v41, %v629_v42 }
 0x3c0   : > { %633 = vst.msk [vmem:[%s234_s5] sm:$0xff] %vm257_vm0, %v630_v43 }
 0x3c1   : > { %1048 = shalt.err (!%p1045_p13)
}
 0x3c2   : > { %828 = dma.vmem_to_hbm [thread:$0]  (%p1215_p0), %s649_s6, 128, %s651_s9, %s635_s10  }
 0x3c5   : > { %v631_v44 = vpop.f32.mrf.mxu3 }
 0x3c6 PF: > { %s662_s7 = sand.u32 1, %s1087_s12   ;;  %p842_p2 = pnand %p754_p6, %p1222_p5 }
 0x3c7   : > { %s663_s26 = scalar_lea.sflag [#allocation5], %s662_s7 }
 0x3c8   : > { %p843_p4 = pneg %p842_p2 }
 0x3ca   : > { %1082 = dma.done.wait (%p843_p4), %s663_s26, 128  }
 0x3cb   : > { %1084 = vsyncadd (%p843_p4), %s663_s26, 4294967168  ;;  %s20_s17 = sadd.s32 1, %s1107_s17   ;;  %s1330_s12 = smov %s1091_s13 }
 0x3cc   : > { %p17_p7 = scmp.ge.s32.totalorder %s20_s17, 4   ;;  %s1331_s13 = smov %s1095_s14 }
 0x3cd   : > { %s1332_s14 = smov %s1220_s22  ;;  %s1333_s15 = smov %s1103_s16 }
 0x3ce   : > { %s1334_s16 = smov %s1336_s8  ;;  %19 = sbr.rel (!%p17_p7) target bundleno = 7 (0x7), region = 91 }
 0x3d3   :  { %669 = vsyncpa [#allocation4], 1 }
 0x3d4   :  { %671 = vsyncpa [#allocation4 + $0x1], 1 }
 0x3d5   :  { %672 = vsyncpa [#allocation7], 1 }
 0x3d6   :  { %673 = vsyncpa [#allocation5], 1 }
 0x3d7   :  { %675 = vsyncpa [#allocation5 + $0x1], 1 }

// kernel: tpu_custom_call.1
= control target key start
LH: loop header
LB: loop body
LE: loop exit
PB: predicated region body
PF: predicated region fallthrough
CT: control target
= control target key end

     0   :  { %8 = vsyncpa [#allocation4], 0  ;;  %s1321_s0 = inlined_call_operand.hbm [shape: bf16[2,8,32], index: 0, kind: input, shape index: {}]   ;;  %s1322_s1 = inlined_call_operand.hbm [shape: bf16[4,32,32], index: 1, kind: input, shape index: {}]   ;;  %s1323_s2 = inlined_call_operand.hbm [shape: f32[4,1,32], index: 2, kind: input, shape index: {}]   ;;  %s1324_s3 = inlined_call_operand.hbm [shape: f32[2,8,32], index: 3, kind: output, shape index: {}]  }
   0x1   :  { %10 = vsyncpa [#allocation4 + $0x1], 0 }
   0x2   :  { %11 = vsyncpa [#allocation7], 0 }
   0x3   :  { %12 = vsyncpa [#allocation5], 0 }
   0x4   :  { %14 = vsyncpa [#allocation5 + $0x1], 0  ;;  %s1141_s12 = smov 0   ;;  %s1143_s13 = smov 0  }
   0x5   :  { %s1145_s14 = smov 0   ;;  %s1147_s15 = smov 0  }
   0x6   :  { %s1149_s16 = smov 0   ;;  %s1151_s17 = smov 0  }
   0x7 LB: > { %s749_s18 = sadd.s32 4294967295, %s1107_s17   ;;  %p751_p0 = scmp.ge.s32.totalorder %s1107_s17, 1  ;;  %s1107_s17 = sphi %s1151_s17, %s20_s17   ;;  %s1103_s16 = sphi %s1149_s16, %s1334_s16   ;;  %s1099_s15 = sphi %s1147_s15, %s1333_s15   ;;  %s1095_s14 = sphi %s1145_s14, %s1332_s14   ;;  %s1091_s13 = sphi %s1143_s13, %s1331_s13   ;;  %s1087_s12 = sphi %s1141_s12, %s1330_s12  }
   0x8   : > { %p1175_p1 = scmp.eq.s32.totalorder %s749_s18, 0  ;;  %p133_p2 = scmp.lt.s32.totalorder %s1107_s17, 3 }
   0x9   : > { %s144_s22 = sshll.u32 %s1322_s1, 4  ;;  %s1109_s24 = smov [#allocation6]   ;;  %s145_s22 = int_to_ptr.hbm [resolvable:$true] %s144_s22 }
   0xa   : > { %p1183_p3 = pnand %p751_p0, %p133_p2  ;;  %s146_s25 = sshll.u32 %s1109_s24, 4  ;;  %s147_s25 = int_to_ptr.vmem [resolvable:$true] %s146_s25 }
   0xb   : > { %p754_p6 = scmp.ge.s32.totalorder %s1107_s17, 2  ;;  %s158_s28 = sshll.u32 %s1323_s2, 4  ;;  %s159_s28 = int_to_ptr.hbm [resolvable:$true] %s158_s28 }
   0xc   : > { %p830_p4 = pneg %p1183_p3  ;;  %s1110_s29 = smov 64  }
   0xd   : > { %s1111_s30 = smov 4   ;;  %s1112_s4 = smov [#allocation8]  }
   0xe   : > { %p831_p5 = pnand %p830_p4, %p1175_p1  ;;  %s160_s5 = sshll.u32 %s1112_s4, 4  ;;  %s161_s5 = int_to_ptr.vmem [resolvable:$true] %s160_s5 }
   0xf   : > { %s1113_s6 = smov 16   ;;  %s1114_s7 = smov 1  }
  0x10   : > { %833 = dma.hbm_to_vmem [thread:$0]  (!%p831_p5), %s145_s22, 1024, %s147_s25, [#allocation7], %s1110_s29, %s1110_s29, %s1111_s30  }
  0x11   : > { %836 = dma.hbm_to_vmem [thread:$0]  (!%p831_p5), %s159_s28, 64, %s161_s5, [#allocation7], %s1113_s6, %s1113_s6, %s1114_s7  }
  0x12   : > { %s32_s8 = sadd.s32 1, %s1103_s16  ;;  %s750_s9 = sadd.s32 4294967294, %s1107_s17  }
  0x13   : > { %p34_p7 = scmp.ge.s32.totalorder %s32_s8, 2  ;;  %s39_s10 = sadd.s32 1, %s1095_s14 }
  0x14   : > { %p46_p8 = scmp.ne.s32.totalorder %s1095_s14, %s1091_s13  ;;  %p47_p9 = scmp.eq.s32.totalorder %s1107_s17, 0 }
  0x15   : > { %s1336_s8 = smov (%p34_p7, %s32_s8), 0  ;;  %p52_p10 = scmp.ne.s32.totalorder %s1091_s13, %s1087_s12 }
  0x16   : > { %s36_s11 = ssub.s32 %s1103_s16, %s1336_s8  ;;  %p120_p11 = scmp.eq.s32.totalorder %s749_s18, 1 }
  0x17   : > { %p37_p12 = scmp.eq.s32.totalorder %s36_s11, 0  ;;  %p1211_p13 = por %p1175_p1, %p52_p10 }
  0x18   : > { %p1215_p0 = por %p120_p11, %p46_p8  ;;  %p126_p2 = scmp.eq.s32.totalorder %s750_s9, 1 }
  0x19   : > { %s1220_s22 = scalar_select %p37_p12, %s1095_s14, %s39_s10  }
  0x1a   : > { %p48_p4 = por %p47_p9, %p46_p8  ;;  %p1222_p5 = por %p126_p2, %p52_p10 }
  0x1b   : > { %s174_s25 = sand.u32 1, %s1095_s14   ;;  %s756_s18 = sshll.u32 %s1103_s16, 2 }
  0x1c   : > { %p847_p7 = scmp.lt.s32.totalorder %s1107_s17, 2  ;;  %s755_s26 = sshll.u32 %s174_s25, 2 }
  0x1d   : > { %s182_s29 = scalar_lea.hbm %s1321_s0, %s756_s18  ;;  %s178_s4 = scalar_lea.vmem [#allocation3], %s755_s26 }
  0x1e   : > { %s184_s30 = sshll.u32 %s182_s29, 4  ;;  %s186_s5 = sshll.u32 %s178_s4, 4  ;;  %s185_s30 = int_to_ptr.hbm [resolvable:$true] %s184_s30  ;;  %s187_s5 = int_to_ptr.vmem [resolvable:$true] %s186_s5 }
  0x1f   : > { %p838_p11 = pnand %p847_p7, %p48_p4  ;;  %s175_s6 = scalar_lea.sflag [#allocation4], %s174_s25 }
  0x20   : > { %195 = sbr.rel (%p1183_p3) target bundleno = 966 (0x3c6), region = 32  ;;  %s1235_s7 = sand.u32 (!%p1183_p3), 1, %s1091_s13  }
  0x21   : > { %840 = dma.hbm_to_vmem [thread:$0]  (!%p838_p11), %s185_s30, 64, %s187_s5, %s175_s6  }
  0x22   : > { %s758_s9 = sshll.u32 (!%p1183_p3), %s1235_s7, 2  ;;  %s198_s10 = scalar_lea.sflag (!%p1183_p3), [#allocation4], %s1235_s7 }
  0x23   : > { %s201_s11 = scalar_lea.vmem (!%p1183_p3), [#allocation3], %s758_s9 }
  0x25   : > { %1074 = dma.done.wait (%p1211_p13), %s198_s10, 64  }
  0x26   : > { %1076 = vsyncadd (%p1211_p13), %s198_s10, 4294967232 }
  0x27   : > { %1078 = dma.done.wait (%p1175_p1), [#allocation7], 1088  }
  0x28   : > { %1080 = vsyncadd (%p1175_p1), [#allocation7], 4294966208  ;;  %v811_v0 = vld [vmem:[#allocation6 + $0x8] sm:$0xff]  ;;  %v813_v1 = vld [vmem:[#allocation6 + $0x18] sm:$0xff]  ;;  %vm257_vm0 = vcmask 261120   ;;  %vm347_vm1 = vcmask 64512  }
  0x29   : > { %v810_v2 = vld [vmem:[#allocation6] sm:$0xff]  ;;  %267 = vmatpush.bf16.msra.mxu0 %v811_v0  ;;  %302 = vmatpush.bf16.msra.mxu1 %v813_v1  ;;  %v812_v3 = vld [vmem:[#allocation6 + $0x10] sm:$0xff]  ;;  %v236_v4 = vld [vmem:[%s201_s11] sm:$0xf]  ;;  %s1115_s19 = smov 112   ;;  %s1116_s23 = smov 120  }
  0x2a   : > { %v815_v5 = vld [vmem:[#allocation6 + $0x28] sm:$0xff]  ;;  %v814_v6 = vld [vmem:[#allocation6 + $0x20] sm:$0xff]  ;;  %s1117_s20 = smov 104   ;;  %vm380_vm2 = vcmask 1043456   ;;  %vm400_vm3 = vcmask 60416   ;;  %s1118_s25 = smov 8  }
  0x2b   : > { %337 = vmatpush.bf16.msra.mxu2 %v815_v5  ;;  %v911_v7 = vld [vmem:[#allocation8] ss:$0 sm:$0xff]  ;;  %v912_v8 = vld [vmem:[#allocation8 + $0x1] ss:$0 sm:$0xff]  ;;  %v913_v22 = vld [vmem:[#allocation8 + $0x2] ss:$0 sm:$0xff] }
  0x2c   : > { %s1119_s18 = smov 16   ;;  %s1120_s26 = smov 24   ;;  %vm466_vm4 = vcmask 126016   ;;  %vm529_vm5 = vcmask 191616   ;;  %vm592_vm6 = vcmask 257216  }
  0x2d   : > { %268 = vmatpush.bf16.msra.mxu0 %v810_v2  ;;  %303 = vmatpush.bf16.msra.mxu1 %v812_v3  ;;  %s807_s27 = sshll.u32 %s1099_s15, 3  ;;  %s761_s28 = sshll.u32 %s1235_s7, 3 }
  0x2e   : > { %s646_s4 = scalar_lea.hbm %s1324_s3, %s807_s27  ;;  %s234_s5 = scalar_lea.vmem [#allocation9], %s761_s28 }
  0x2f   : > { %338 = vmatpush.bf16.msra.mxu2 %v814_v6  ;;  %s648_s6 = sshll.u32 %s234_s5, 4  ;;  %s650_s9 = sshll.u32 %s646_s4, 4  ;;  %s649_s6 = int_to_ptr.vmem [resolvable:$true] %s648_s6  ;;  %s651_s9 = int_to_ptr.hbm [resolvable:$true] %s650_s9 }
  0x30   : > { %770 = vmatmul.msk.bf16.vlgmr.msra.gmra.mxu0 %vm257_vm0, %v236_v4  ;;  %779 = vmatmul.msk.bf16.vlgmr.msra.gmra.mxu1 %vm257_vm0, %v236_v4  ;;  %s635_s10 = scalar_lea.sflag [#allocation5], %s1235_s7  ;;  %s1035_s11 = sshra.s32 %s651_s9, 4  ;;  %s1036_s11 = int_to_ptr.hbm [resolvable:$true] %s1035_s11 }
  0x31   : > { %s1037_s15 = scalar_lea.hbm %s1036_s11, 8  ;;  %p1042_p9 = scmp.lt.s32.totalorder %s1036_s11, %s1324_s3 }
  0x32   : > { %788 = vmatmul.msk.bf16.vlgmr.msra.gmra.mxu2 %vm257_vm0, %v236_v4  ;;  %p1038_p1 = scmp.ne.s32.totalorder %s1036_s11, %s1037_s15 }
  0x34   : > { %p1039_p3 = pnand %p1038_p1, %p1215_p0 }
  0x36   : > { %p1040_p8 = pneg %p1039_p3 }
  0xad   : > { %v270_v9 = vpop.f32.mrf.mxu0  ;;  %v305_v10 = vpop.f32.mrf.mxu1 }
  0xae   : > { %v271_v11 = vadd.f32 %v911_v7, %v270_v9  ;;  %v306_v12 = vadd.f32 %v912_v8, %v305_v10 }
  0xb0   : > { %v344_v13 = vpack.c.bf16 %v271_v11, %v271_v11  ;;  %v345_v14 = vpack.c.bf16 %v306_v12, %v306_v12 }
  0xb2   : > { %470 = vrot.lane.b32.xlu1 %v345_v14, %s1115_s19  ;;  %406 = vrot.lane.b32.xlu0 %v345_v14, %s1116_s23  ;;  %v352_v15 = vsel %vm347_vm1, %v345_v14, 0 }
  0xb3   : > { %468 = vrot.lane.b32.xlu2 %v344_v13, %s1115_s19  ;;  %361 = vmatpush.bf16.xpose.msra.mxu3 %v352_v15 }
  0xb5   : > { %v272_v16 = vpop.f32.mrf.mxu0  ;;  %v307_v17 = vpop.f32.mrf.mxu1 }
  0xb6   : > { %v340_v23 = vpop.f32.mrf.mxu2 }
  0xb7   : > { %v341_v24 = vadd.f32 %v913_v22, %v340_v23 }
  0xb9   : > { %v346_v25 = vpack.c.bf16 %v341_v24, %v341_v24 }
  0xba   : > { %533 = vrot.lane.b32.xlu1 %v345_v14, %s1117_s20  ;;  %403 = vrot.lane.b32.xlu0 %v344_v13, %s1116_s23 }
  0xbb   : > { %531 = vrot.lane.b32.xlu2 %v344_v13, %s1117_s20  ;;  %789 = vmatmul.msk.bf16.vlgmr.msra.gmra.mxu3 %vm347_vm1, %v344_v13  ;;  %v382_v31 = vsel %vm380_vm2, %v346_v25, 0 }
  0xbc   : > { %391 = vmatpush.bf16.msrb.mxu0 %v382_v31 }
  0xbe   : > { %v342_v30 = vpop.f32.mrf.mxu2 }
  0xc3   : > { %438 = vrot.lane.b32.xlu2 %v346_v25, %s1116_s23 }
 0x10d   : > { %v469_v26 = vpop.permute.xlu2 %468 }
 0x115   : > { %v532_v32 = vpop.permute.xlu2 %531 }
 0x11d   : > { %v439_v43 = vpop.permute.xlu2 %438 }
 0x11e   : > { %v444_v44 = vsel %vm380_vm2, %v439_v43, 0 }
 0x11f   : > { %453 = vmatpush.bf16.msrb.mxu2 %v444_v44 }
 0x124   : > { %v471_v18 = vpop.permute.xlu1 %470  ;;  %v407_v19 = vpop.permute.xlu0 %406 }
 0x125   : > { %v412_v20 = vsel %vm347_vm1, %v407_v19, 0  ;;  %v476_v21 = vsel %vm347_vm1, %v471_v18, 0 }
 0x126   : > { %421 = vmatpush.bf16.xpose.msrb.mxu1 %v412_v20  ;;  %485 = vmatpush.bf16.xpose.msrb.mxu3 %v476_v21 }
 0x12c   : > { %v534_v27 = vpop.permute.xlu1 %533  ;;  %v404_v28 = vpop.permute.xlu0 %403 }
 0x12d   : > { %v539_v29 = vsel %vm347_vm1, %v534_v27, 0  ;;  %791 = vmatmul.msk.bf16.vlgmr.msrb.gmra.mxu1 %vm347_vm1, %v404_v28  ;;  %793 = vmatmul.msk.bf16.vlgmr.msrb.gmra.mxu3 %vm347_vm1, %v469_v26 }
 0x12e   : > { %548 = vmatpush.bf16.xpose.msra.mxu1 %v539_v29 }
 0x13d   : > { %795 = vmatmul.msk.bf16.vlgmr.msra.gmra.mxu1 %vm347_vm1, %v532_v32 }
 0x13e   : > { %v363_v33 = vpop.f32.mrf.mxu3 }
 0x13f   : > { %v367_v34 = vsel %vm347_vm1, %v363_v33, -inf }
 0x140   : > { %368 = vmax.xlane.f32.xlu1 %v367_v34 }
 0x146   : > { %v365_v35 = vpop.f32.mrf.mxu3 }
 0x159   : > { %564 = vrot.lane.b32.xlu1 %v346_v25, %s1117_s20  ;;  %s1041_s20 = scalar_lea.hbm %s1324_s3, 16 }
 0x15a   : > { %p1043_p10 = scmp.lt.s32.totalorder %s1041_s20, %s1037_s15 }
 0x15c   : > { %p1044_p12 = por %p1043_p10, %p1042_p9 }
 0x15e   : > { %p1045_p13 = pnand %p1044_p12, %p1040_p8 }
 0x1aa   : > { %v423_v36 = vpop.f32.mrf.mxu1 }
 0x1ab   : > { %v427_v37 = vsel %vm347_vm1, %v423_v36, -inf }
 0x1ac   : > { %428 = vmax.xlane.f32.xlu0 %v427_v37  ;;  %v816_v37 = vld [vmem:[#allocation6 + $0x30] sm:$0xff] }
 0x1b0   : > { %v487_v38 = vpop.f32.mrf.mxu3 }
 0x1b1   : > { %v491_v41 = vsel %vm347_vm1, %v487_v38, -inf }
 0x1b2   : > { %v425_v39 = vpop.f32.mrf.mxu1 }
 0x1b3   : > { %v369_v40 = vpop.xlane.xlu1 %368 }
 0x1b4   : > { %v370_v42 = vsub.f32 %v363_v33, %v369_v40  ;;  %492 = vmax.xlane.f32.xlu0 %v491_v41  ;;  %v914_v41 = vld [vmem:[#allocation8 + $0x3] ss:$0 sm:$0xff] }
 0x1b6   : > { %v371_v45 = vmul.f32 1.442695, %v370_v42 }
 0x1b8   : > { %915 = vpow2.f32 %v371_v45  ;;  %v489_v46 = vpop.f32.mrf.mxu3 }
 0x1ba   : > { %v550_v47 = vpop.f32.mrf.mxu1 }
 0x1bb   : > { %v554_v48 = vsel %vm347_vm1, %v550_v47, -inf }
 0x1bc   : > { %555 = vmax.xlane.f32.xlu2 %v554_v48 }
 0x1be   : > { %v916_v49 = vpop.eup %915 }
 0x1bf   : > { %v373_v50 = vsel %vm347_vm1, %v916_v49, 0.0  ;;  %v376_v51 = vpack.c.bf16 %v916_v49, %v916_v49 }
 0x1c0   : > { %374 = vadd.xlane.f32.xlu1 %v373_v50 }
 0x1c1   : > { %790 = vmatmul.msk.bf16.vlgmr.msrb.gmra.mxu0 %vm347_vm1, %v376_v51 }
 0x1c2   : > { %v552_v52 = vpop.f32.mrf.mxu1 }
 0x1cb   : > { %v565_v53 = vpop.permute.xlu1 %564 }
 0x1cc   : > { %v570_v54 = vsel %vm380_vm2, %v565_v53, 0 }
 0x1cd   : > { %579 = vmatpush.bf16.msra.mxu2 %v570_v54 }
 0x1d4   : > { %501 = vrot.lane.b32.xlu2 %v346_v25, %s1115_s19 }
 0x21f   : > { %v429_v55 = vpop.xlane.xlu0 %428 }
 0x220   : > { %v430_v56 = vsub.f32 %v423_v36, %v429_v55  ;;  %v817_v36 = vld [vmem:[#allocation6 + $0x38] sm:$0xff] }
 0x221   : > { %626 = vmatpush.bf16.msra.mxu3 %v817_v36 }
 0x222   : > { %v431_v57 = vmul.f32 1.442695, %v430_v56 }
 0x224   : > { %917 = vpow2.f32 %v431_v57 }
 0x225   : > { %627 = vmatpush.bf16.msra.mxu3 %v816_v37 }
 0x227   : > { %v493_v58 = vpop.xlane.xlu0 %492 }
 0x228   : > { %v494_v59 = vsub.f32 %v487_v38, %v493_v58 }
 0x22a   : > { %v918_v60 = vpop.eup %917  ;;  %v495_v61 = vmul.f32 1.442695, %v494_v59 }
 0x22b   : > { %v433_v62 = vsel %vm347_vm1, %v918_v60, 0.0  ;;  %v436_v63 = vpack.c.bf16 %v918_v60, %v918_v60 }
 0x22c   : > { %919 = vpow2.f32 %v495_v61  ;;  %434 = vadd.xlane.f32.xlu0 %v433_v62 }
 0x22d   : > { %792 = vmatmul.msk.bf16.vlgmr.msrb.gmra.mxu2 %vm347_vm1, %v436_v63 }
 0x22f   : > { %v556_v0 = vpop.xlane.xlu2 %555 }
 0x230   : > { %v557_v1 = vsub.f32 %v550_v47, %v556_v0 }
 0x232   : > { %v920_v2 = vpop.eup %919  ;;  %v558_v3 = vmul.f32 1.442695, %v557_v1 }
 0x233   : > { %v497_v4 = vsel %vm347_vm1, %v920_v2, 0.0  ;;  %v375_v5 = vpop.xlane.xlu1 %374  ;;  %v500_v9 = vpack.c.bf16 %v920_v2, %v920_v2 }
 0x234   : > { %921 = vpow2.f32 %v558_v3  ;;  %498 = vadd.xlane.f32.xlu0 %v497_v4 }
 0x235   : > { %923 = vrcp.f32 %v375_v5 }
 0x237   : > { %v502_v6 = vpop.permute.xlu2 %501 }
 0x238   : > { %v507_v7 = vsel %vm380_vm2, %v502_v6, 0 }
 0x239   : > { %516 = vmatpush.bf16.msra.mxu0 %v507_v7 }
 0x23a   : > { %v922_v8 = vpop.eup %921 }
 0x23b   : > { %v563_v10 = vpack.c.bf16 %v922_v8, %v922_v8  ;;  %v560_v11 = vsel %vm347_vm1, %v922_v8, 0.0  ;;  %v924_v12 = vpop.eup %923 }
 0x23c   : > { %794 = vmatmul.msk.bf16.vlgmr.msra.gmra.mxu0 %vm347_vm1, %v500_v9  ;;  %561 = vadd.xlane.f32.xlu0 %v560_v11 }
 0x23d   : > { %796 = vmatmul.msk.bf16.vlgmr.msra.gmra.mxu2 %vm347_vm1, %v563_v10 }
 0x23e   : > { %v393_v13 = vpop.f32.mrf.mxu0 }
 0x23f   : > { %v398_v14 = vmul.f32 %v924_v12, %v393_v13 }
 0x241   : > { %v399_v15 = vpack.c.bf16 %v398_v14, %v398_v14 }
 0x243   : > { %401 = vst.msk [vmem:[#allocation2] sm:$0xf] %vm400_vm3, %v399_v15 }
 0x246   : > { %v395_v16 = vpop.f32.mrf.mxu0 }
 0x29f   : > { %v435_v17 = vpop.xlane.xlu0 %434 }
 0x2a0   : > { %925 = vrcp.f32 %v435_v17 }
 0x2a6   : > { %v926_v19 = vpop.eup %925 }
 0x2a7   : > { %v499_v18 = vpop.xlane.xlu0 %498 }
 0x2a8   : > { %927 = vrcp.f32 %v499_v18 }
 0x2ae   : > { %v928_v25 = vpop.eup %927 }
 0x2af   : > { %v562_v23 = vpop.xlane.xlu0 %561 }
 0x2b0   : > { %v455_v20 = vpop.f32.mrf.mxu2  ;;  %929 = vrcp.f32 %v562_v23 }
 0x2b1   : > { %v460_v21 = vmul.f32 %v926_v19, %v455_v20 }
 0x2b3   : > { %v461_v22 = vpack.c.bf16 %v460_v21, %v460_v21 }
 0x2b5   : > { %463 = vrot.lane.b32.xlu2 %v461_v22, %s1118_s25 }
 0x2b6   : > { %v930_v29 = vpop.eup %929 }
 0x2b8   : > { %v457_v24 = vpop.f32.mrf.mxu2 }
 0x2b9   : > { %v518_v26 = vpop.f32.mrf.mxu0 }
 0x2ba   : > { %v523_v27 = vmul.f32 %v928_v25, %v518_v26 }
 0x2bc   : > { %v524_v28 = vpack.c.bf16 %v523_v27, %v523_v27 }
 0x2be   : > { %526 = vrot.lane.b32.xlu0 %v524_v28, %s1119_s18 }
 0x2c0   : > { %v581_v30 = vpop.f32.mrf.mxu2 }
 0x2c1   : > { %v586_v31 = vmul.f32 %v930_v29, %v581_v30  ;;  %v520_v32 = vpop.f32.mrf.mxu0 }
 0x2c3   : > { %v587_v33 = vpack.c.bf16 %v586_v31, %v586_v31 }
 0x2c5   : > { %589 = vrot.lane.b32.xlu2 %v587_v33, %s1120_s26 }
 0x2c8   : > { %v583_v34 = vpop.f32.mrf.mxu2 }
 0x30f   : > { %v464_v35 = vpop.permute.xlu2 %463 }
 0x310   : > { %467 = vst.msk [vmem:[#allocation2] sm:$0xf] %vm466_vm4, %v464_v35 }
 0x31f   : > { %v590_v39 = vpop.permute.xlu2 %589 }
 0x330   : > { %v527_v38 = vpop.permute.xlu0 %526 }
 0x331   : > { %530 = vst.msk [vmem:[#allocation2] sm:$0xf] %vm529_vm5, %v527_v38 }
 0x332   : > { %593 = vst.msk [vmem:[#allocation2] sm:$0xf] %vm592_vm6, %v590_v39 }
 0x339   : > { %v594_v40 = vld [vmem:[#allocation2] sm:$0xf] }
 0x33a   : > { %805 = vmatmul.msk.bf16.vlgmr.msra.gmra.mxu3 %vm257_vm0, %v594_v40 }
 0x3bd   : > { %v629_v42 = vpop.f32.mrf.mxu3 }
 0x3be   : > { %v630_v43 = vadd.f32 %v914_v41, %v629_v42 }
 0x3c0   : > { %633 = vst.msk [vmem:[%s234_s5] sm:$0xff] %vm257_vm0, %v630_v43 }
 0x3c1   : > { %1048 = shalt.err (!%p1045_p13)
}
 0x3c2   : > { %828 = dma.vmem_to_hbm [thread:$0]  (%p1215_p0), %s649_s6, 128, %s651_s9, %s635_s10  }
 0x3c5   : > { %v631_v44 = vpop.f32.mrf.mxu3 }
 0x3c6 PF: > { %s662_s7 = sand.u32 1, %s1087_s12   ;;  %p842_p2 = pnand %p754_p6, %p1222_p5 }
 0x3c7   : > { %s663_s26 = scalar_lea.sflag [#allocation5], %s662_s7 }
 0x3c8   : > { %p843_p4 = pneg %p842_p2 }
 0x3ca   : > { %1082 = dma.done.wait (%p843_p4), %s663_s26, 128  }
 0x3cb   : > { %1084 = vsyncadd (%p843_p4), %s663_s26, 4294967168  ;;  %s20_s17 = sadd.s32 1, %s1107_s17   ;;  %s1330_s12 = smov %s1091_s13 }
 0x3cc   : > { %p17_p7 = scmp.ge.s32.totalorder %s20_s17, 4   ;;  %s1331_s13 = smov %s1095_s14 }
 0x3cd   : > { %s1332_s14 = smov %s1220_s22  ;;  %s1333_s15 = smov %s1103_s16 }
 0x3ce   : > { %s1334_s16 = smov %s1336_s8  ;;  %19 = sbr.rel (!%p17_p7) target bundleno = 7 (0x7), region = 91 }
 0x3d3   :  { %669 = vsyncpa [#allocation4], 1 }
 0x3d4   :  { %671 = vsyncpa [#allocation4 + $0x1], 1 }
 0x3d5   :  { %672 = vsyncpa [#allocation7], 1 }
 0x3d6   :  { %673 = vsyncpa [#allocation5], 1 }
 0x3d7   :  { %675 = vsyncpa [#allocation5 + $0x1], 1 }

</bundles_post_ra>
